<compile_context>
chip_gen: v7x
topology: tpu7x:2x2x1
jax: 0.10.0
libtpu: 0.0.40
codegen_flags: <defaults>
</compile_context>

<pallas_src>
import functools
import math

import jax
import jax.numpy as jnp
import numpy as np
from jax.experimental import pallas as pl
from jax.experimental.pallas import tpu as pltpu


# ----------------------------- helpers --------------------------------------
def _layernorm(x, g, b, eps=1e-5):
    mu = jnp.mean(x, axis=-1, keepdims=True)
    var = jnp.mean((x - mu) ** 2, axis=-1, keepdims=True)
    return (x - mu) * jax.lax.rsqrt(var + eps) * g + b


# ----------------------------- kernel 1: transformer stack ------------------
def minigpt_layer_kernel(n_head, b_per_tile, S,
                         x_hbm,
                         wqkv_ref, bqkv_ref, wo_ref, bo_ref,
                         g1_ref, b1_ref, w1_ref, bf1_ref, w2_ref, bf2_ref,
                         g2_ref, b2_ref,
                         gf_ref, bfin_ref,
                         o_ref,
                         x_sc, dma_sem):
    """grid = (batch_tiles, n_layer); one step == one layer for one batch tile.

    The residual stream lives in x_sc (VMEM) for the whole network; the last
    layer also applies ln_f and writes the normalized activations (bf16)."""
    b = pl.program_id(0)
    l = pl.program_id(1)
    L = pl.num_programs(1)
    rows, E = x_sc.shape
    H = n_head
    dh = E // H

    # Pull this batch tile's input rows from HBM into the resident buffer once.
    @pl.when(l == 0)
    def _():
        cp = pltpu.make_async_copy(x_hbm.at[pl.ds(b * rows, rows), :], x_sc, dma_sem)
        cp.start()
        cp.wait()

    x = x_sc[...]                                       # (rows, E) f32 residual
    xb = x.astype(jnp.bfloat16)

    # fused QKV projection (PyTorch MHA in_proj); scale already folded into Q.
    qkv = jnp.dot(xb, wqkv_ref[...],
                  preferred_element_type=jnp.float32) + bqkv_ref[...]   # (rows, 3E)

    # Multi-head attention.  Per-head outputs are folded directly into the
    # output projection (no attention scratch, no lane-offset stores):
    #   attn = bo + sum_h softmax(Q_h K_h^T) V_h @ Wo[h*dh:(h+1)*dh, :]
    attn = bo_ref[...].astype(jnp.float32)              # (1, E), broadcasts
    for h in range(H):
        qh = qkv[:, h * dh:(h + 1) * dh]
        kh = qkv[:, E + h * dh:E + (h + 1) * dh]
        vh = qkv[:, 2 * E + h * dh:2 * E + (h + 1) * dh]
        q3 = qh.reshape(b_per_tile, S, dh).astype(jnp.bfloat16)
        k3 = kh.reshape(b_per_tile, S, dh).astype(jnp.bfloat16)
        v3 = vh.reshape(b_per_tile, S, dh).astype(jnp.bfloat16)
        s = jnp.einsum("bqd,bkd->bqk", q3, k3,
                       preferred_element_type=jnp.float32)              # (b,S,S)
        s = s - jnp.max(s, axis=-1, keepdims=True)
        p = jnp.exp(s)
        p = p * pl.reciprocal(jnp.sum(p, axis=-1, keepdims=True), approx=True)
        oh = jnp.einsum("bqk,bkd->bqd", p.astype(jnp.bfloat16), v3,
                        preferred_element_type=jnp.float32)             # (b,S,dh)
        oh2 = oh.reshape(rows, dh).astype(jnp.bfloat16)
        attn = attn + jnp.dot(oh2, wo_ref[h * dh:(h + 1) * dh, :],
                              preferred_element_type=jnp.float32)

    # residual + LayerNorm 1 (f32 statistics)
    x1 = _layernorm(x + attn, g1_ref[...], b1_ref[...])
    x1b = x1.astype(jnp.bfloat16)

    # FFN: Linear(E,4E) -> ReLU -> Linear(4E,E), hidden dim chunked so the
    # (rows, 4E) f32 hidden never has to be materialized through VMEM.
    F4 = w1_ref.shape[1]
    chunk = min(F4, 512)
    ff = bf2_ref[...].astype(jnp.float32)               # (1, E), broadcasts
    for c0 in range(0, F4, chunk):
        c1 = min(c0 + chunk, F4)
        h1 = jnp.dot(x1b, w1_ref[:, c0:c1],
                     preferred_element_type=jnp.float32) + bf1_ref[:, c0:c1]
        h1 = jnp.maximum(h1, 0.0)
        ff = ff + jnp.dot(h1.astype(jnp.bfloat16), w2_ref[c0:c1, :],
                          preferred_element_type=jnp.float32)

    # residual + LayerNorm 2, write back to the resident buffer
    x2 = _layernorm(x1 + ff, g2_ref[...], b2_ref[...])
    x_sc[...] = x2

    # last layer: apply ln_f and emit bf16 activations for the head kernel
    @pl.when(l == L - 1)
    def _():
        xf = _layernorm(x2, gf_ref[...], bfin_ref[...])
        o_ref[...] = xf.astype(o_ref.dtype)


# ----------------------------- kernel 2: vocab head -------------------------
def minigpt_head_kernel(x_ref, wh_ref, bh_ref, o_ref):
    o_ref[...] = jnp.dot(x_ref[...], wh_ref[...],
                         preferred_element_type=jnp.float32) + bh_ref[...]


# ----------------------------- wrapper --------------------------------------
def minigpt_forward(idx, params, n_head, vocab_size):
    B, S = idx.shape
    E = params["tok_emb"].shape[1]
    BS = B * S
    dh = E // n_head
    scale = 1.0 / math.sqrt(dh)

    # embedding gather + positional embedding (plain-JAX glue)
    x = jnp.take(params["tok_emb"], idx, axis=0) + params["pos_emb"][:, :S, :]
    x = x.astype(jnp.float32).reshape(BS, E)

    # stack per-layer params along a leading layer axis; fold the attention
    # scale into the Q columns of wqkv/bqkv; matmul weights -> bf16.
    blocks = params["blocks"]
    L = len(blocks)
    stacked = [jnp.stack([blk[i] for blk in blocks]) for i in range(12)]
    q_scale = jnp.concatenate([jnp.full((E,), scale, jnp.float32),
                               jnp.ones((2 * E,), jnp.float32)])
    stacked[0] = stacked[0] * q_scale                    # wqkv (L, E, 3E)
    stacked[1] = stacked[1] * q_scale                    # bqkv (L, 1, 3E)
    for i in (0, 2, 6, 8):                               # wqkv, wo, w1, w2
        stacked[i] = stacked[i].astype(jnp.bfloat16)

    # batch-tile grid: 2 tiles when divisible (uses both TCs on v7x), else 1.
    n_bt = 2 if (B % 2 == 0 and ((B // 2) * S) % 8 == 0) else 1
    b_per_tile = B // n_bt
    rows_pt = b_per_tile * S

    layer_specs = [
        pl.BlockSpec((None,) + tuple(arr.shape[1:]), lambda b, l: (l, 0, 0))
        for arr in stacked
    ]
    gf, bfin, wh, bh = params["final"]

    # VMEM budget: ~double-buffered per-layer weights + residual, capped at
    # 56 MiB so it also fits v7x's 64 MiB physical VMEM.
    per_layer_bytes = sum(int(arr.nbytes) // L for arr in stacked)
    vmem_layer = int(min(56 * 2 ** 20,
                         max(32 * 2 ** 20,
                             3 * per_layer_bytes + 8 * rows_pt * E * 4)))

    xf = pl.pallas_call(
        functools.partial(minigpt_layer_kernel, n_head, b_per_tile, S),
        out_shape=jax.ShapeDtypeStruct((BS, E), jnp.bfloat16),
        grid=(n_bt, L),
        in_specs=([pl.BlockSpec(memory_space=pl.ANY)]      # x stays in HBM
                  + layer_specs
                  + [pl.BlockSpec((1, E), lambda b, l: (0, 0)),   # ln_f gamma
                     pl.BlockSpec((1, E), lambda b, l: (0, 0))]), # ln_f beta
        out_specs=pl.BlockSpec((rows_pt, E), lambda b, l: (b, 0)),
        scratch_shapes=[pltpu.VMEM((rows_pt, E), jnp.float32),    # residual x
                        pltpu.SemaphoreType.DMA],                 # x load sem
        compiler_params=pltpu.CompilerParams(
            dimension_semantics=("parallel", "arbitrary"),
            vmem_limit_bytes=vmem_layer),
    )(x, *stacked, gf, bfin)

    # ---- head: separate pallas_call tiled over (row_tile, vocab_tile) ------
    V = vocab_size
    voc_t = min(512, ((V + 127) // 128) * 128)           # lane-dense vocab tile
    V_pad = ((V + voc_t - 1) // voc_t) * voc_t
    wh_p = jnp.zeros((E, V_pad), jnp.bfloat16).at[:, :V].set(wh.astype(jnp.bfloat16))
    bh_p = jnp.zeros((1, V_pad), jnp.float32).at[:, :V].set(bh)

    if BS <= 256:
        row_t = BS
    elif BS % 256 == 0:
        row_t = 256
    elif BS % 128 == 0:
        row_t = 128
    else:
        row_t = BS

    logits = pl.pallas_call(
        minigpt_head_kernel,
        out_shape=jax.ShapeDtypeStruct((BS, V_pad), jnp.float32),
        grid=(BS // row_t, V_pad // voc_t),
        in_specs=[pl.BlockSpec((row_t, E), lambda i, j: (i, 0)),
                  pl.BlockSpec((E, voc_t), lambda i, j: (0, j)),
                  pl.BlockSpec((1, voc_t), lambda i, j: (0, j))],
        out_specs=pl.BlockSpec((row_t, voc_t), lambda i, j: (i, j)),
        compiler_params=pltpu.CompilerParams(
            dimension_semantics=("parallel", "parallel"),
            vmem_limit_bytes=48 * 2 ** 20),
    )(xf, wh_p, bh_p)

    return logits[:, :V].reshape(B, S, V)


# ----------------------------- params ---------------------------------------
def init_params(key, vocab_size, n_embd, n_layer, block_size):
    def nrm(k, shape, scale=0.02):
        return (scale * jax.random.normal(k, shape)).astype(jnp.float32)

    keys = jax.random.split(key, 3 + n_layer)
    params = {
        "tok_emb": nrm(keys[0], (vocab_size, n_embd)),
        "pos_emb": nrm(keys[1], (1, block_size, n_embd)),
        "blocks": [],
    }
    E = n_embd
    for li in range(n_layer):
        bk = jax.random.split(keys[2 + li], 6)
        params["blocks"].append([
            nrm(bk[0], (E, 3 * E)),                     # wqkv (pre-transposed)
            nrm(bk[1], (1, 3 * E)),                     # bqkv
            nrm(bk[2], (E, E)),                         # wo
            jnp.zeros((1, E), jnp.float32),             # bo
            jnp.ones((1, E), jnp.float32),              # ln1 gamma
            jnp.zeros((1, E), jnp.float32),             # ln1 beta
            nrm(bk[3], (E, 4 * E)),                     # ff w1
            jnp.zeros((1, 4 * E), jnp.float32),         # ff b1
            nrm(bk[4], (4 * E, E)),                     # ff w2
            jnp.zeros((1, E), jnp.float32),             # ff b2
            jnp.ones((1, E), jnp.float32),              # ln2 gamma
            jnp.zeros((1, E), jnp.float32),             # ln2 beta
        ])
    hk = jax.random.split(keys[-1], 2)
    params["final"] = [
        jnp.ones((1, n_embd), jnp.float32),             # ln_f gamma
        jnp.zeros((1, n_embd), jnp.float32),            # ln_f beta
        nrm(hk[0], (n_embd, vocab_size)),               # head W (pre-transposed)
        nrm(hk[1], (1, vocab_size)),                    # head b
    ]
    return params


# ----------------------------- reference ------------------------------------
def minigpt_reference(idx, params, n_head):
    B, S = idx.shape
    x = jnp.take(params["tok_emb"], idx, axis=0) + params["pos_emb"][:, :S, :]
    for (wqkv, bqkv, wo, bo, g1, b1, w1, bf1, w2, bf2, g2, b2) in params["blocks"]:
        E = x.shape[-1]
        dh = E // n_head
        qkv = x @ wqkv + bqkv
        q, k, v = qkv[..., :E], qkv[..., E:2 * E], qkv[..., 2 * E:]
        qh = q.reshape(B, S, n_head, dh).transpose(0, 2, 1, 3)
        kh = k.reshape(B, S, n_head, dh).transpose(0, 2, 1, 3)
        vh = v.reshape(B, S, n_head, dh).transpose(0, 2, 1, 3)
        s = jnp.einsum("bhqd,bhkd->bhqk", qh, kh) / math.sqrt(dh)
        p = jax.nn.softmax(s, axis=-1)
        o = jnp.einsum("bhqk,bhkd->bhqd", p, vh).transpose(0, 2, 1, 3).reshape(B, S, E)
        attn = o @ wo + bo
        x = _layernorm(x + attn, g1, b1)
        ff = jnp.maximum(x @ w1 + bf1, 0.0) @ w2 + bf2
        x = _layernorm(x + ff, g2, b2)
    gf, bf, wh, bh = params["final"]
    return _layernorm(x, gf, bf) @ wh + bh


if __name__ == "__main__":
    # small, forward-consistent shapes
    vocab_size, n_embd, n_head, n_layer, block_size = 64, 32, 4, 2, 16
    batch, seq = 2, 8

    key = jax.random.PRNGKey(0)
    pkey, ikey = jax.random.split(key)
    params = init_params(pkey, vocab_size, n_embd, n_layer, block_size)
    idx = jax.random.randint(ikey, (batch, seq), 0, vocab_size, dtype=jnp.int32)

    logits = minigpt_forward(idx, params, n_head, vocab_size)
    logits = jax.block_until_ready(logits)
    assert logits.shape == (batch, seq, vocab_size)

    # sanity check vs. f32 pure-JAX reference (tolerance loosened for bf16 matmuls)
    with jax.default_matmul_precision("float32"):
        ref = jax.block_until_ready(minigpt_reference(idx, params, n_head))
    np.testing.assert_allclose(np.asarray(logits), np.asarray(ref), rtol=5e-2, atol=5e-2)

    print("KERNEL_OK")
</pallas_src>

<mosaic_0001>
module attributes {stable_mosaic.version = 11 : i64} {
  func.func @minigpt_layer_kernel(%arg0: i32, %arg1: i32, %arg2: memref<16x32xf32, #tpu.memory_space<any>>, %arg3: memref<1x32x96xbf16, #tpu.memory_space<vmem>>, %arg4: memref<1x1x96xf32, #tpu.memory_space<vmem>>, %arg5: memref<1x32x32xbf16, #tpu.memory_space<vmem>>, %arg6: memref<1x1x32xf32, #tpu.memory_space<vmem>>, %arg7: memref<1x1x32xf32, #tpu.memory_space<vmem>>, %arg8: memref<1x1x32xf32, #tpu.memory_space<vmem>>, %arg9: memref<1x32x128xbf16, #tpu.memory_space<vmem>>, %arg10: memref<1x1x128xf32, #tpu.memory_space<vmem>>, %arg11: memref<1x128x32xbf16, #tpu.memory_space<vmem>>, %arg12: memref<1x1x32xf32, #tpu.memory_space<vmem>>, %arg13: memref<1x1x32xf32, #tpu.memory_space<vmem>>, %arg14: memref<1x1x32xf32, #tpu.memory_space<vmem>>, %arg15: memref<1x32xf32, #tpu.memory_space<vmem>>, %arg16: memref<1x32xf32, #tpu.memory_space<vmem>>, %arg17: memref<8x32xbf16, #tpu.memory_space<vmem>>, %arg18: memref<8x32xf32, #tpu.memory_space<vmem>>, %arg19: memref<!tpu.dma_semaphore, #tpu.memory_space<semaphore_mem>>) attributes {dimension_semantics = [#tpu.dimension_semantics<parallel>, #tpu.dimension_semantics<arbitrary>], iteration_bounds = array<i64: 2, 2>, scalar_prefetch = 0 : i64, scratch_operands = 2 : i64, tpu.core_type = #tpu.core_type<tc>, window_params = [{}, {transform_indices = @transform_1, window_bounds = array<i64: 1, 32, 96>}, {transform_indices = @transform_2, window_bounds = array<i64: 1, 1, 96>}, {transform_indices = @transform_3, window_bounds = array<i64: 1, 32, 32>}, {transform_indices = @transform_4, window_bounds = array<i64: 1, 1, 32>}, {transform_indices = @transform_5, window_bounds = array<i64: 1, 1, 32>}, {transform_indices = @transform_6, window_bounds = array<i64: 1, 1, 32>}, {transform_indices = @transform_7, window_bounds = array<i64: 1, 32, 128>}, {transform_indices = @transform_8, window_bounds = array<i64: 1, 1, 128>}, {transform_indices = @transform_9, window_bounds = array<i64: 1, 128, 32>}, {transform_indices = @transform_10, window_bounds = array<i64: 1, 1, 32>}, {transform_indices = @transform_11, window_bounds = array<i64: 1, 1, 32>}, {transform_indices = @transform_12, window_bounds = array<i64: 1, 1, 32>}, {pipeline_mode = #tpu.pipeline_mode<synchronous>, transform_indices = @transform_13, window_bounds = array<i64: 1, 32>}, {pipeline_mode = #tpu.pipeline_mode<synchronous>, transform_indices = @transform_14, window_bounds = array<i64: 1, 32>}, {transform_indices = @transform_15, window_bounds = array<i64: 8, 32>}]} {
    %c0_i32 = arith.constant 0 : i32
    %0 = arith.cmpi eq, %arg1, %c0_i32 : i32
    %1 = arith.extui %0 : i1 to i32
    %c0_i32_0 = arith.constant 0 : i32
    %2 = arith.cmpi ne, %1, %c0_i32_0 : i32
    scf.if %2 {
      %c8_i32 = arith.constant 8 : i32
      %203 = arith.muli %arg0, %c8_i32 : i32
      %c0_i32_80 = arith.constant 0 : i32
      %204 = tpu.memref_slice %arg2[%203, %c0_i32_80] : memref<16x32xf32, #tpu.memory_space<any>> -> memref<8x32xf32, #tpu.memory_space<any>>
      tpu.enqueue_dma source(%204 : memref<8x32xf32, #tpu.memory_space<any>>) target(%arg18 : memref<8x32xf32, #tpu.memory_space<vmem>>) target_semaphore(%arg19 : memref<!tpu.dma_semaphore, #tpu.memory_space<semaphore_mem>>)
      %c0_i32_81 = arith.constant 0 : i32
      %205 = tpu.memref_slice %arg2[%203, %c0_i32_81] : memref<16x32xf32, #tpu.memory_space<any>> -> memref<8x32xf32, #tpu.memory_space<any>>
      tpu.wait_dma2 semaphore(%arg19 : memref<!tpu.dma_semaphore, #tpu.memory_space<semaphore_mem>>) src(%205 : memref<8x32xf32, #tpu.memory_space<any>>) dst(%arg18 : memref<8x32xf32, #tpu.memory_space<vmem>>)
    } else {
    }
    %c0 = arith.constant 0 : index
    %c0_1 = arith.constant 0 : index
    %3 = vector.load %arg18[%c0, %c0_1] : memref<8x32xf32, #tpu.memory_space<vmem>>, vector<8x32xf32>
    %4 = arith.truncf %3 : vector<8x32xf32> to vector<8x32xbf16>
    %c0_2 = arith.constant 0 : index
    %c0_3 = arith.constant 0 : index
    %c0_4 = arith.constant 0 : index
    %5 = vector.load %arg3[%c0_2, %c0_3, %c0_4] : memref<1x32x96xbf16, #tpu.memory_space<vmem>>, vector<1x32x96xbf16>
    %6 = vector.shape_cast %5 : vector<1x32x96xbf16> to vector<32x96xbf16>
    %cst = arith.constant dense<0.000000e+00> : vector<8x96xf32>
    %7 = tpu.matmul %4, %6, %cst {dimension_numbers = #tpu.dot_dimension_numbers<[1], [0], [0], [1], [0, 0, 1, 1], [], []>} : vector<8x32xbf16>, vector<32x96xbf16>, vector<8x96xf32> -> vector<8x96xf32>
    %c0_5 = arith.constant 0 : index
    %c0_6 = arith.constant 0 : index
    %c0_7 = arith.constant 0 : index
    %8 = vector.load %arg4[%c0_5, %c0_6, %c0_7] : memref<1x1x96xf32, #tpu.memory_space<vmem>>, vector<1x1x96xf32>
    %9 = vector.shape_cast %8 : vector<1x1x96xf32> to vector<1x96xf32>
    %10 = vector.broadcast %9 : vector<1x96xf32> to vector<8x96xf32>
    %11 = arith.addf %7, %10 : vector<8x96xf32>
    %c0_8 = arith.constant 0 : index
    %c0_9 = arith.constant 0 : index
    %c0_10 = arith.constant 0 : index
    %12 = vector.load %arg6[%c0_8, %c0_9, %c0_10] : memref<1x1x32xf32, #tpu.memory_space<vmem>>, vector<1x1x32xf32>
    %13 = vector.shape_cast %12 : vector<1x1x32xf32> to vector<1x32xf32>
    %14 = vector.extract_strided_slice %11 {offsets = [0, 0], sizes = [8, 8], strides = [1, 1]} : vector<8x96xf32> to vector<8x8xf32>
    %15 = vector.extract_strided_slice %11 {offsets = [0, 32], sizes = [8, 8], strides = [1, 1]} : vector<8x96xf32> to vector<8x8xf32>
    %16 = vector.extract_strided_slice %11 {offsets = [0, 64], sizes = [8, 8], strides = [1, 1]} : vector<8x96xf32> to vector<8x8xf32>
    %17 = vector.shape_cast %14 : vector<8x8xf32> to vector<1x8x8xf32>
    %18 = arith.truncf %17 : vector<1x8x8xf32> to vector<1x8x8xbf16>
    %19 = vector.shape_cast %15 : vector<8x8xf32> to vector<1x8x8xf32>
    %20 = arith.truncf %19 : vector<1x8x8xf32> to vector<1x8x8xbf16>
    %21 = vector.shape_cast %16 : vector<8x8xf32> to vector<1x8x8xf32>
    %22 = arith.truncf %21 : vector<1x8x8xf32> to vector<1x8x8xbf16>
    "tpu.trace_start"() <{level = 10 : i32, message = "bqd,bkd->bqk"}> : () -> ()
    %cst_11 = arith.constant dense<0.000000e+00> : vector<1x8x8xf32>
    %23 = tpu.matmul %18, %20, %cst_11 {dimension_numbers = #tpu.dot_dimension_numbers<[2], [2], [1], [1], [0, 0, 0, 1, 1, 1], [0], [0]>} : vector<1x8x8xbf16>, vector<1x8x8xbf16>, vector<1x8x8xf32> -> vector<1x8x8xf32>
    "tpu.trace_stop"() : () -> ()
    %cst_12 = arith.constant dense<0xFF800000> : vector<1x8xf32>
    %24 = vector.multi_reduction <maximumf>, %23, %cst_12 [2] : vector<1x8x8xf32> to vector<1x8xf32>
    %25 = vector.shape_cast %24 : vector<1x8xf32> to vector<1x8x1xf32>
    %26 = vector.broadcast %25 : vector<1x8x1xf32> to vector<1x8x8xf32>
    %27 = arith.subf %23, %26 : vector<1x8x8xf32>
    %28 = math.exp %27 : vector<1x8x8xf32>
    %cst_13 = arith.constant dense<0.000000e+00> : vector<1x8xf32>
    %29 = vector.multi_reduction <add>, %28, %cst_13 [2] : vector<1x8x8xf32> to vector<1x8xf32>
    %30 = vector.shape_cast %29 : vector<1x8xf32> to vector<1x8x1xf32>
    %31 = tpu.reciprocal %30 {approx = true} : vector<1x8x1xf32> -> vector<1x8x1xf32>
    %32 = vector.broadcast %31 : vector<1x8x1xf32> to vector<1x8x8xf32>
    %33 = arith.mulf %28, %32 : vector<1x8x8xf32>
    %34 = arith.truncf %33 : vector<1x8x8xf32> to vector<1x8x8xbf16>
    "tpu.trace_start"() <{level = 10 : i32, message = "bqk,bkd->bqd"}> : () -> ()
    %cst_14 = arith.constant dense<0.000000e+00> : vector<1x8x8xf32>
    %35 = tpu.matmul %34, %22, %cst_14 {dimension_numbers = #tpu.dot_dimension_numbers<[2], [1], [1], [2], [0, 0, 0, 1, 1, 2], [0], [0]>} : vector<1x8x8xbf16>, vector<1x8x8xbf16>, vector<1x8x8xf32> -> vector<1x8x8xf32>
    "tpu.trace_stop"() : () -> ()
    %36 = vector.shape_cast %35 : vector<1x8x8xf32> to vector<8x8xf32>
    %37 = arith.truncf %36 : vector<8x8xf32> to vector<8x8xbf16>
    %c0_15 = arith.constant 0 : index
    %c0_16 = arith.constant 0 : index
    %c0_17 = arith.constant 0 : index
    %38 = vector.load %arg5[%c0_15, %c0_16, %c0_17] : memref<1x32x32xbf16, #tpu.memory_space<vmem>>, vector<1x8x32xbf16>
    %39 = vector.shape_cast %38 : vector<1x8x32xbf16> to vector<8x32xbf16>
    %cst_18 = arith.constant dense<0.000000e+00> : vector<8x32xf32>
    %40 = tpu.matmul %37, %39, %cst_18 {dimension_numbers = #tpu.dot_dimension_numbers<[1], [0], [0], [1], [0, 0, 1, 1], [], []>} : vector<8x8xbf16>, vector<8x32xbf16>, vector<8x32xf32> -> vector<8x32xf32>
    %41 = vector.broadcast %13 : vector<1x32xf32> to vector<8x32xf32>
    %42 = arith.addf %41, %40 : vector<8x32xf32>
    %43 = vector.extract_strided_slice %11 {offsets = [0, 8], sizes = [8, 8], strides = [1, 1]} : vector<8x96xf32> to vector<8x8xf32>
    %44 = vector.extract_strided_slice %11 {offsets = [0, 40], sizes = [8, 8], strides = [1, 1]} : vector<8x96xf32> to vector<8x8xf32>
    %45 = vector.extract_strided_slice %11 {offsets = [0, 72], sizes = [8, 8], strides = [1, 1]} : vector<8x96xf32> to vector<8x8xf32>
    %46 = vector.shape_cast %43 : vector<8x8xf32> to vector<1x8x8xf32>
    %47 = arith.truncf %46 : vector<1x8x8xf32> to vector<1x8x8xbf16>
    %48 = vector.shape_cast %44 : vector<8x8xf32> to vector<1x8x8xf32>
    %49 = arith.truncf %48 : vector<1x8x8xf32> to vector<1x8x8xbf16>
    %50 = vector.shape_cast %45 : vector<8x8xf32> to vector<1x8x8xf32>
    %51 = arith.truncf %50 : vector<1x8x8xf32> to vector<1x8x8xbf16>
    "tpu.trace_start"() <{level = 10 : i32, message = "bqd,bkd->bqk"}> : () -> ()
    %cst_19 = arith.constant dense<0.000000e+00> : vector<1x8x8xf32>
    %52 = tpu.matmul %47, %49, %cst_19 {dimension_numbers = #tpu.dot_dimension_numbers<[2], [2], [1], [1], [0, 0, 0, 1, 1, 1], [0], [0]>} : vector<1x8x8xbf16>, vector<1x8x8xbf16>, vector<1x8x8xf32> -> vector<1x8x8xf32>
    "tpu.trace_stop"() : () -> ()
    %cst_20 = arith.constant dense<0xFF800000> : vector<1x8xf32>
    %53 = vector.multi_reduction <maximumf>, %52, %cst_20 [2] : vector<1x8x8xf32> to vector<1x8xf32>
    %54 = vector.shape_cast %53 : vector<1x8xf32> to vector<1x8x1xf32>
    %55 = vector.broadcast %54 : vector<1x8x1xf32> to vector<1x8x8xf32>
    %56 = arith.subf %52, %55 : vector<1x8x8xf32>
    %57 = math.exp %56 : vector<1x8x8xf32>
    %cst_21 = arith.constant dense<0.000000e+00> : vector<1x8xf32>
    %58 = vector.multi_reduction <add>, %57, %cst_21 [2] : vector<1x8x8xf32> to vector<1x8xf32>
    %59 = vector.shape_cast %58 : vector<1x8xf32> to vector<1x8x1xf32>
    %60 = tpu.reciprocal %59 {approx = true} : vector<1x8x1xf32> -> vector<1x8x1xf32>
    %61 = vector.broadcast %60 : vector<1x8x1xf32> to vector<1x8x8xf32>
    %62 = arith.mulf %57, %61 : vector<1x8x8xf32>
    %63 = arith.truncf %62 : vector<1x8x8xf32> to vector<1x8x8xbf16>
    "tpu.trace_start"() <{level = 10 : i32, message = "bqk,bkd->bqd"}> : () -> ()
    %cst_22 = arith.constant dense<0.000000e+00> : vector<1x8x8xf32>
    %64 = tpu.matmul %63, %51, %cst_22 {dimension_numbers = #tpu.dot_dimension_numbers<[2], [1], [1], [2], [0, 0, 0, 1, 1, 2], [0], [0]>} : vector<1x8x8xbf16>, vector<1x8x8xbf16>, vector<1x8x8xf32> -> vector<1x8x8xf32>
    "tpu.trace_stop"() : () -> ()
    %65 = vector.shape_cast %64 : vector<1x8x8xf32> to vector<8x8xf32>
    %66 = arith.truncf %65 : vector<8x8xf32> to vector<8x8xbf16>
    %c0_23 = arith.constant 0 : index
    %c8 = arith.constant 8 : index
    %c0_24 = arith.constant 0 : index
    %67 = vector.load %arg5[%c0_23, %c8, %c0_24] : memref<1x32x32xbf16, #tpu.memory_space<vmem>>, vector<1x8x32xbf16>
    %68 = vector.shape_cast %67 : vector<1x8x32xbf16> to vector<8x32xbf16>
    %cst_25 = arith.constant dense<0.000000e+00> : vector<8x32xf32>
    %69 = tpu.matmul %66, %68, %cst_25 {dimension_numbers = #tpu.dot_dimension_numbers<[1], [0], [0], [1], [0, 0, 1, 1], [], []>} : vector<8x8xbf16>, vector<8x32xbf16>, vector<8x32xf32> -> vector<8x32xf32>
    %70 = arith.addf %42, %69 : vector<8x32xf32>
    %71 = vector.extract_strided_slice %11 {offsets = [0, 16], sizes = [8, 8], strides = [1, 1]} : vector<8x96xf32> to vector<8x8xf32>
    %72 = vector.extract_strided_slice %11 {offsets = [0, 48], sizes = [8, 8], strides = [1, 1]} : vector<8x96xf32> to vector<8x8xf32>
    %73 = vector.extract_strided_slice %11 {offsets = [0, 80], sizes = [8, 8], strides = [1, 1]} : vector<8x96xf32> to vector<8x8xf32>
    %74 = vector.shape_cast %71 : vector<8x8xf32> to vector<1x8x8xf32>
    %75 = arith.truncf %74 : vector<1x8x8xf32> to vector<1x8x8xbf16>
    %76 = vector.shape_cast %72 : vector<8x8xf32> to vector<1x8x8xf32>
    %77 = arith.truncf %76 : vector<1x8x8xf32> to vector<1x8x8xbf16>
    %78 = vector.shape_cast %73 : vector<8x8xf32> to vector<1x8x8xf32>
    %79 = arith.truncf %78 : vector<1x8x8xf32> to vector<1x8x8xbf16>
    "tpu.trace_start"() <{level = 10 : i32, message = "bqd,bkd->bqk"}> : () -> ()
    %cst_26 = arith.constant dense<0.000000e+00> : vector<1x8x8xf32>
    %80 = tpu.matmul %75, %77, %cst_26 {dimension_numbers = #tpu.dot_dimension_numbers<[2], [2], [1], [1], [0, 0, 0, 1, 1, 1], [0], [0]>} : vector<1x8x8xbf16>, vector<1x8x8xbf16>, vector<1x8x8xf32> -> vector<1x8x8xf32>
    "tpu.trace_stop"() : () -> ()
    %cst_27 = arith.constant dense<0xFF800000> : vector<1x8xf32>
    %81 = vector.multi_reduction <maximumf>, %80, %cst_27 [2] : vector<1x8x8xf32> to vector<1x8xf32>
    %82 = vector.shape_cast %81 : vector<1x8xf32> to vector<1x8x1xf32>
    %83 = vector.broadcast %82 : vector<1x8x1xf32> to vector<1x8x8xf32>
    %84 = arith.subf %80, %83 : vector<1x8x8xf32>
    %85 = math.exp %84 : vector<1x8x8xf32>
    %cst_28 = arith.constant dense<0.000000e+00> : vector<1x8xf32>
    %86 = vector.multi_reduction <add>, %85, %cst_28 [2] : vector<1x8x8xf32> to vector<1x8xf32>
    %87 = vector.shape_cast %86 : vector<1x8xf32> to vector<1x8x1xf32>
    %88 = tpu.reciprocal %87 {approx = true} : vector<1x8x1xf32> -> vector<1x8x1xf32>
    %89 = vector.broadcast %88 : vector<1x8x1xf32> to vector<1x8x8xf32>
    %90 = arith.mulf %85, %89 : vector<1x8x8xf32>
    %91 = arith.truncf %90 : vector<1x8x8xf32> to vector<1x8x8xbf16>
    "tpu.trace_start"() <{level = 10 : i32, message = "bqk,bkd->bqd"}> : () -> ()
    %cst_29 = arith.constant dense<0.000000e+00> : vector<1x8x8xf32>
    %92 = tpu.matmul %91, %79, %cst_29 {dimension_numbers = #tpu.dot_dimension_numbers<[2], [1], [1], [2], [0, 0, 0, 1, 1, 2], [0], [0]>} : vector<1x8x8xbf16>, vector<1x8x8xbf16>, vector<1x8x8xf32> -> vector<1x8x8xf32>
    "tpu.trace_stop"() : () -> ()
    %93 = vector.shape_cast %92 : vector<1x8x8xf32> to vector<8x8xf32>
    %94 = arith.truncf %93 : vector<8x8xf32> to vector<8x8xbf16>
    %c0_30 = arith.constant 0 : index
    %c16 = arith.constant 16 : index
    %c0_31 = arith.constant 0 : index
    %95 = vector.load %arg5[%c0_30, %c16, %c0_31] : memref<1x32x32xbf16, #tpu.memory_space<vmem>>, vector<1x8x32xbf16>
    %96 = vector.shape_cast %95 : vector<1x8x32xbf16> to vector<8x32xbf16>
    %cst_32 = arith.constant dense<0.000000e+00> : vector<8x32xf32>
    %97 = tpu.matmul %94, %96, %cst_32 {dimension_numbers = #tpu.dot_dimension_numbers<[1], [0], [0], [1], [0, 0, 1, 1], [], []>} : vector<8x8xbf16>, vector<8x32xbf16>, vector<8x32xf32> -> vector<8x32xf32>
    %98 = arith.addf %70, %97 : vector<8x32xf32>
    %99 = vector.extract_strided_slice %11 {offsets = [0, 24], sizes = [8, 8], strides = [1, 1]} : vector<8x96xf32> to vector<8x8xf32>
    %100 = vector.extract_strided_slice %11 {offsets = [0, 56], sizes = [8, 8], strides = [1, 1]} : vector<8x96xf32> to vector<8x8xf32>
    %101 = vector.extract_strided_slice %11 {offsets = [0, 88], sizes = [8, 8], strides = [1, 1]} : vector<8x96xf32> to vector<8x8xf32>
    %102 = vector.shape_cast %99 : vector<8x8xf32> to vector<1x8x8xf32>
    %103 = arith.truncf %102 : vector<1x8x8xf32> to vector<1x8x8xbf16>
    %104 = vector.shape_cast %100 : vector<8x8xf32> to vector<1x8x8xf32>
    %105 = arith.truncf %104 : vector<1x8x8xf32> to vector<1x8x8xbf16>
    %106 = vector.shape_cast %101 : vector<8x8xf32> to vector<1x8x8xf32>
    %107 = arith.truncf %106 : vector<1x8x8xf32> to vector<1x8x8xbf16>
    "tpu.trace_start"() <{level = 10 : i32, message = "bqd,bkd->bqk"}> : () -> ()
    %cst_33 = arith.constant dense<0.000000e+00> : vector<1x8x8xf32>
    %108 = tpu.matmul %103, %105, %cst_33 {dimension_numbers = #tpu.dot_dimension_numbers<[2], [2], [1], [1], [0, 0, 0, 1, 1, 1], [0], [0]>} : vector<1x8x8xbf16>, vector<1x8x8xbf16>, vector<1x8x8xf32> -> vector<1x8x8xf32>
    "tpu.trace_stop"() : () -> ()
    %cst_34 = arith.constant dense<0xFF800000> : vector<1x8xf32>
    %109 = vector.multi_reduction <maximumf>, %108, %cst_34 [2] : vector<1x8x8xf32> to vector<1x8xf32>
    %110 = vector.shape_cast %109 : vector<1x8xf32> to vector<1x8x1xf32>
    %111 = vector.broadcast %110 : vector<1x8x1xf32> to vector<1x8x8xf32>
    %112 = arith.subf %108, %111 : vector<1x8x8xf32>
    %113 = math.exp %112 : vector<1x8x8xf32>
    %cst_35 = arith.constant dense<0.000000e+00> : vector<1x8xf32>
    %114 = vector.multi_reduction <add>, %113, %cst_35 [2] : vector<1x8x8xf32> to vector<1x8xf32>
    %115 = vector.shape_cast %114 : vector<1x8xf32> to vector<1x8x1xf32>
    %116 = tpu.reciprocal %115 {approx = true} : vector<1x8x1xf32> -> vector<1x8x1xf32>
    %117 = vector.broadcast %116 : vector<1x8x1xf32> to vector<1x8x8xf32>
    %118 = arith.mulf %113, %117 : vector<1x8x8xf32>
    %119 = arith.truncf %118 : vector<1x8x8xf32> to vector<1x8x8xbf16>
    "tpu.trace_start"() <{level = 10 : i32, message = "bqk,bkd->bqd"}> : () -> ()
    %cst_36 = arith.constant dense<0.000000e+00> : vector<1x8x8xf32>
    %120 = tpu.matmul %119, %107, %cst_36 {dimension_numbers = #tpu.dot_dimension_numbers<[2], [1], [1], [2], [0, 0, 0, 1, 1, 2], [0], [0]>} : vector<1x8x8xbf16>, vector<1x8x8xbf16>, vector<1x8x8xf32> -> vector<1x8x8xf32>
    "tpu.trace_stop"() : () -> ()
    %121 = vector.shape_cast %120 : vector<1x8x8xf32> to vector<8x8xf32>
    %122 = arith.truncf %121 : vector<8x8xf32> to vector<8x8xbf16>
    %c0_37 = arith.constant 0 : index
    %c24 = arith.constant 24 : index
    %c0_38 = arith.constant 0 : index
    %123 = vector.load %arg5[%c0_37, %c24, %c0_38] : memref<1x32x32xbf16, #tpu.memory_space<vmem>>, vector<1x8x32xbf16>
    %124 = vector.shape_cast %123 : vector<1x8x32xbf16> to vector<8x32xbf16>
    %cst_39 = arith.constant dense<0.000000e+00> : vector<8x32xf32>
    %125 = tpu.matmul %122, %124, %cst_39 {dimension_numbers = #tpu.dot_dimension_numbers<[1], [0], [0], [1], [0, 0, 1, 1], [], []>} : vector<8x8xbf16>, vector<8x32xbf16>, vector<8x32xf32> -> vector<8x32xf32>
    %126 = arith.addf %98, %125 : vector<8x32xf32>
    %127 = arith.addf %3, %126 : vector<8x32xf32>
    %c0_40 = arith.constant 0 : index
    %c0_41 = arith.constant 0 : index
    %c0_42 = arith.constant 0 : index
    %128 = vector.load %arg7[%c0_40, %c0_41, %c0_42] : memref<1x1x32xf32, #tpu.memory_space<vmem>>, vector<1x1x32xf32>
    %129 = vector.shape_cast %128 : vector<1x1x32xf32> to vector<1x32xf32>
    %c0_43 = arith.constant 0 : index
    %c0_44 = arith.constant 0 : index
    %c0_45 = arith.constant 0 : index
    %130 = vector.load %arg8[%c0_43, %c0_44, %c0_45] : memref<1x1x32xf32, #tpu.memory_space<vmem>>, vector<1x1x32xf32>
    %131 = vector.shape_cast %130 : vector<1x1x32xf32> to vector<1x32xf32>
    %cst_46 = arith.constant dense<0.000000e+00> : vector<8xf32>
    %132 = vector.multi_reduction <add>, %127, %cst_46 [1] : vector<8x32xf32> to vector<8xf32>
    %133 = vector.shape_cast %132 : vector<8xf32> to vector<8x1xf32>
    %cst_47 = arith.constant 3.200000e+01 : f32
    %134 = vector.broadcast %cst_47 : f32 to vector<8x1xf32>
    %135 = arith.divf %133, %134 : vector<8x1xf32>
    %136 = vector.broadcast %135 : vector<8x1xf32> to vector<8x32xf32>
    %137 = arith.subf %127, %136 : vector<8x32xf32>
    %138 = arith.mulf %137, %137 : vector<8x32xf32>
    %cst_48 = arith.constant dense<0.000000e+00> : vector<8xf32>
    %139 = vector.multi_reduction <add>, %138, %cst_48 [1] : vector<8x32xf32> to vector<8xf32>
    %140 = vector.shape_cast %139 : vector<8xf32> to vector<8x1xf32>
    %cst_49 = arith.constant 3.200000e+01 : f32
    %141 = vector.broadcast %cst_49 : f32 to vector<8x1xf32>
    %142 = arith.divf %140, %141 : vector<8x1xf32>
    %143 = vector.broadcast %135 : vector<8x1xf32> to vector<8x32xf32>
    %144 = arith.subf %127, %143 : vector<8x32xf32>
    %cst_50 = arith.constant 9.99999974E-6 : f32
    %145 = vector.broadcast %cst_50 : f32 to vector<8x1xf32>
    %146 = arith.addf %142, %145 : vector<8x1xf32>
    %147 = math.rsqrt %146 : vector<8x1xf32>
    %148 = vector.broadcast %147 : vector<8x1xf32> to vector<8x32xf32>
    %149 = arith.mulf %144, %148 : vector<8x32xf32>
    %150 = vector.broadcast %129 : vector<1x32xf32> to vector<8x32xf32>
    %151 = arith.mulf %149, %150 : vector<8x32xf32>
    %152 = vector.broadcast %131 : vector<1x32xf32> to vector<8x32xf32>
    %153 = arith.addf %151, %152 : vector<8x32xf32>
    %154 = arith.truncf %153 : vector<8x32xf32> to vector<8x32xbf16>
    %c0_51 = arith.constant 0 : index
    %c0_52 = arith.constant 0 : index
    %c0_53 = arith.constant 0 : index
    %155 = vector.load %arg12[%c0_51, %c0_52, %c0_53] : memref<1x1x32xf32, #tpu.memory_space<vmem>>, vector<1x1x32xf32>
    %156 = vector.shape_cast %155 : vector<1x1x32xf32> to vector<1x32xf32>
    %c0_54 = arith.constant 0 : index
    %c0_55 = arith.constant 0 : index
    %c0_56 = arith.constant 0 : index
    %157 = vector.load %arg9[%c0_54, %c0_55, %c0_56] : memref<1x32x128xbf16, #tpu.memory_space<vmem>>, vector<1x32x128xbf16>
    %158 = vector.shape_cast %157 : vector<1x32x128xbf16> to vector<32x128xbf16>
    %cst_57 = arith.constant dense<0.000000e+00> : vector<8x128xf32>
    %159 = tpu.matmul %154, %158, %cst_57 {dimension_numbers = #tpu.dot_dimension_numbers<[1], [0], [0], [1], [0, 0, 1, 1], [], []>} : vector<8x32xbf16>, vector<32x128xbf16>, vector<8x128xf32> -> vector<8x128xf32>
    %c0_58 = arith.constant 0 : index
    %c0_59 = arith.constant 0 : index
    %c0_60 = arith.constant 0 : index
    %160 = vector.load %arg10[%c0_58, %c0_59, %c0_60] : memref<1x1x128xf32, #tpu.memory_space<vmem>>, vector<1x1x128xf32>
    %161 = vector.shape_cast %160 : vector<1x1x128xf32> to vector<1x128xf32>
    %162 = vector.broadcast %161 : vector<1x128xf32> to vector<8x128xf32>
    %163 = arith.addf %159, %162 : vector<8x128xf32>
    %cst_61 = arith.constant 0.000000e+00 : f32
    %164 = vector.broadcast %cst_61 : f32 to vector<8x128xf32>
    %165 = arith.maximumf %163, %164 : vector<8x128xf32>
    %166 = arith.truncf %165 : vector<8x128xf32> to vector<8x128xbf16>
    %c0_62 = arith.constant 0 : index
    %c0_63 = arith.constant 0 : index
    %c0_64 = arith.constant 0 : index
    %167 = vector.load %arg11[%c0_62, %c0_63, %c0_64] : memref<1x128x32xbf16, #tpu.memory_space<vmem>>, vector<1x128x32xbf16>
    %168 = vector.shape_cast %167 : vector<1x128x32xbf16> to vector<128x32xbf16>
    %cst_65 = arith.constant dense<0.000000e+00> : vector<8x32xf32>
    %169 = tpu.matmul %166, %168, %cst_65 {dimension_numbers = #tpu.dot_dimension_numbers<[1], [0], [0], [1], [0, 0, 1, 1], [], []>} : vector<8x128xbf16>, vector<128x32xbf16>, vector<8x32xf32> -> vector<8x32xf32>
    %170 = vector.broadcast %156 : vector<1x32xf32> to vector<8x32xf32>
    %171 = arith.addf %170, %169 : vector<8x32xf32>
    %172 = arith.addf %153, %171 : vector<8x32xf32>
    %c0_66 = arith.constant 0 : index
    %c0_67 = arith.constant 0 : index
    %c0_68 = arith.constant 0 : index
    %173 = vector.load %arg13[%c0_66, %c0_67, %c0_68] : memref<1x1x32xf32, #tpu.memory_space<vmem>>, vector<1x1x32xf32>
    %174 = vector.shape_cast %173 : vector<1x1x32xf32> to vector<1x32xf32>
    %c0_69 = arith.constant 0 : index
    %c0_70 = arith.constant 0 : index
    %c0_71 = arith.constant 0 : index
    %175 = vector.load %arg14[%c0_69, %c0_70, %c0_71] : memref<1x1x32xf32, #tpu.memory_space<vmem>>, vector<1x1x32xf32>
    %176 = vector.shape_cast %175 : vector<1x1x32xf32> to vector<1x32xf32>
    %cst_72 = arith.constant dense<0.000000e+00> : vector<8xf32>
    %177 = vector.multi_reduction <add>, %172, %cst_72 [1] : vector<8x32xf32> to vector<8xf32>
    %178 = vector.shape_cast %177 : vector<8xf32> to vector<8x1xf32>
    %cst_73 = arith.constant 3.200000e+01 : f32
    %179 = vector.broadcast %cst_73 : f32 to vector<8x1xf32>
    %180 = arith.divf %178, %179 : vector<8x1xf32>
    %181 = vector.broadcast %180 : vector<8x1xf32> to vector<8x32xf32>
    %182 = arith.subf %172, %181 : vector<8x32xf32>
    %183 = arith.mulf %182, %182 : vector<8x32xf32>
    %cst_74 = arith.constant dense<0.000000e+00> : vector<8xf32>
    %184 = vector.multi_reduction <add>, %183, %cst_74 [1] : vector<8x32xf32> to vector<8xf32>
    %185 = vector.shape_cast %184 : vector<8xf32> to vector<8x1xf32>
    %cst_75 = arith.constant 3.200000e+01 : f32
    %186 = vector.broadcast %cst_75 : f32 to vector<8x1xf32>
    %187 = arith.divf %185, %186 : vector<8x1xf32>
    %188 = vector.broadcast %180 : vector<8x1xf32> to vector<8x32xf32>
    %189 = arith.subf %172, %188 : vector<8x32xf32>
    %cst_76 = arith.constant 9.99999974E-6 : f32
    %190 = vector.broadcast %cst_76 : f32 to vector<8x1xf32>
    %191 = arith.addf %187, %190 : vector<8x1xf32>
    %192 = math.rsqrt %191 : vector<8x1xf32>
    %193 = vector.broadcast %192 : vector<8x1xf32> to vector<8x32xf32>
    %194 = arith.mulf %189, %193 : vector<8x32xf32>
    %195 = vector.broadcast %174 : vector<1x32xf32> to vector<8x32xf32>
    %196 = arith.mulf %194, %195 : vector<8x32xf32>
    %197 = vector.broadcast %176 : vector<1x32xf32> to vector<8x32xf32>
    %198 = arith.addf %196, %197 : vector<8x32xf32>
    %c0_77 = arith.constant 0 : index
    %c0_78 = arith.constant 0 : index
    %199 = vector.load %arg18[%c0_77, %c0_78] : memref<8x32xf32, #tpu.memory_space<vmem>>, vector<8x32xf32>
    tpu.vector_store %arg18[%c0_77, %c0_78], %198 {strides = array<i32>} : memref<8x32xf32, #tpu.memory_space<vmem>>, vector<8x32xf32>,
    %c1_i32 = arith.constant 1 : i32
    %200 = arith.cmpi eq, %arg1, %c1_i32 : i32
    %201 = arith.extui %200 : i1 to i32
    %c0_i32_79 = arith.constant 0 : i32
    %202 = arith.cmpi ne, %201, %c0_i32_79 : i32
    scf.if %202 {
      %c0_80 = arith.constant 0 : index
      %c0_81 = arith.constant 0 : index
      %203 = vector.load %arg15[%c0_80, %c0_81] : memref<1x32xf32, #tpu.memory_space<vmem>>, vector<1x32xf32>
      %c0_82 = arith.constant 0 : index
      %c0_83 = arith.constant 0 : index
      %204 = vector.load %arg16[%c0_82, %c0_83] : memref<1x32xf32, #tpu.memory_space<vmem>>, vector<1x32xf32>
      %cst_84 = arith.constant dense<0.000000e+00> : vector<8xf32>
      %205 = vector.multi_reduction <add>, %198, %cst_84 [1] : vector<8x32xf32> to vector<8xf32>
      %206 = vector.shape_cast %205 : vector<8xf32> to vector<8x1xf32>
      %cst_85 = arith.constant 3.200000e+01 : f32
      %207 = vector.broadcast %cst_85 : f32 to vector<8x1xf32>
      %208 = arith.divf %206, %207 : vector<8x1xf32>
      %209 = vector.broadcast %208 : vector<8x1xf32> to vector<8x32xf32>
      %210 = arith.subf %198, %209 : vector<8x32xf32>
      %211 = arith.mulf %210, %210 : vector<8x32xf32>
      %cst_86 = arith.constant dense<0.000000e+00> : vector<8xf32>
      %212 = vector.multi_reduction <add>, %211, %cst_86 [1] : vector<8x32xf32> to vector<8xf32>
      %213 = vector.shape_cast %212 : vector<8xf32> to vector<8x1xf32>
      %cst_87 = arith.constant 3.200000e+01 : f32
      %214 = vector.broadcast %cst_87 : f32 to vector<8x1xf32>
      %215 = arith.divf %213, %214 : vector<8x1xf32>
      %216 = vector.broadcast %208 : vector<8x1xf32> to vector<8x32xf32>
      %217 = arith.subf %198, %216 : vector<8x32xf32>
      %cst_88 = arith.constant 9.99999974E-6 : f32
      %218 = vector.broadcast %cst_88 : f32 to vector<8x1xf32>
      %219 = arith.addf %215, %218 : vector<8x1xf32>
      %220 = math.rsqrt %219 : vector<8x1xf32>
      %221 = vector.broadcast %220 : vector<8x1xf32> to vector<8x32xf32>
      %222 = arith.mulf %217, %221 : vector<8x32xf32>
      %223 = vector.broadcast %203 : vector<1x32xf32> to vector<8x32xf32>
      %224 = arith.mulf %222, %223 : vector<8x32xf32>
      %225 = vector.broadcast %204 : vector<1x32xf32> to vector<8x32xf32>
      %226 = arith.addf %224, %225 : vector<8x32xf32>
      %227 = arith.truncf %226 : vector<8x32xf32> to vector<8x32xbf16>
      %c0_89 = arith.constant 0 : index
      %c0_90 = arith.constant 0 : index
      %228 = vector.load %arg17[%c0_89, %c0_90] : memref<8x32xbf16, #tpu.memory_space<vmem>>, vector<8x32xbf16>
      tpu.vector_store %arg17[%c0_89, %c0_90], %227 {strides = array<i32>} : memref<8x32xbf16, #tpu.memory_space<vmem>>, vector<8x32xbf16>,
    } else {
    }
    return
  }
  func.func @transform_1(%arg0: i32, %arg1: i32) -> (i32, i32, i32) {
    %c0_i32 = arith.constant 0 : i32
    %c0_i32_0 = arith.constant 0 : i32
    %c0_i32_1 = arith.constant 0 : i32
    return %arg1, %c0_i32, %c0_i32_0 : i32, i32, i32
  }
  func.func @transform_2(%arg0: i32, %arg1: i32) -> (i32, i32, i32) {
    %c0_i32 = arith.constant 0 : i32
    %c0_i32_0 = arith.constant 0 : i32
    %c0_i32_1 = arith.constant 0 : i32
    return %arg1, %c0_i32, %c0_i32_0 : i32, i32, i32
  }
  func.func @transform_3(%arg0: i32, %arg1: i32) -> (i32, i32, i32) {
    %c0_i32 = arith.constant 0 : i32
    %c0_i32_0 = arith.constant 0 : i32
    %c0_i32_1 = arith.constant 0 : i32
    return %arg1, %c0_i32, %c0_i32_0 : i32, i32, i32
  }
  func.func @transform_4(%arg0: i32, %arg1: i32) -> (i32, i32, i32) {
    %c0_i32 = arith.constant 0 : i32
    %c0_i32_0 = arith.constant 0 : i32
    %c0_i32_1 = arith.constant 0 : i32
    return %arg1, %c0_i32, %c0_i32_0 : i32, i32, i32
  }
  func.func @transform_5(%arg0: i32, %arg1: i32) -> (i32, i32, i32) {
    %c0_i32 = arith.constant 0 : i32
    %c0_i32_0 = arith.constant 0 : i32
    %c0_i32_1 = arith.constant 0 : i32
    return %arg1, %c0_i32, %c0_i32_0 : i32, i32, i32
  }
  func.func @transform_6(%arg0: i32, %arg1: i32) -> (i32, i32, i32) {
    %c0_i32 = arith.constant 0 : i32
    %c0_i32_0 = arith.constant 0 : i32
    %c0_i32_1 = arith.constant 0 : i32
    return %arg1, %c0_i32, %c0_i32_0 : i32, i32, i32
  }
  func.func @transform_7(%arg0: i32, %arg1: i32) -> (i32, i32, i32) {
    %c0_i32 = arith.constant 0 : i32
    %c0_i32_0 = arith.constant 0 : i32
    %c0_i32_1 = arith.constant 0 : i32
    return %arg1, %c0_i32, %c0_i32_0 : i32, i32, i32
  }
  func.func @transform_8(%arg0: i32, %arg1: i32) -> (i32, i32, i32) {
    %c0_i32 = arith.constant 0 : i32
    %c0_i32_0 = arith.constant 0 : i32
    %c0_i32_1 = arith.constant 0 : i32
    return %arg1, %c0_i32, %c0_i32_0 : i32, i32, i32
  }
  func.func @transform_9(%arg0: i32, %arg1: i32) -> (i32, i32, i32) {
    %c0_i32 = arith.constant 0 : i32
    %c0_i32_0 = arith.constant 0 : i32
    %c0_i32_1 = arith.constant 0 : i32
    return %arg1, %c0_i32, %c0_i32_0 : i32, i32, i32
  }
  func.func @transform_10(%arg0: i32, %arg1: i32) -> (i32, i32, i32) {
    %c0_i32 = arith.constant 0 : i32
    %c0_i32_0 = arith.constant 0 : i32
    %c0_i32_1 = arith.constant 0 : i32
    return %arg1, %c0_i32, %c0_i32_0 : i32, i32, i32
  }
  func.func @transform_11(%arg0: i32, %arg1: i32) -> (i32, i32, i32) {
    %c0_i32 = arith.constant 0 : i32
    %c0_i32_0 = arith.constant 0 : i32
    %c0_i32_1 = arith.constant 0 : i32
    return %arg1, %c0_i32, %c0_i32_0 : i32, i32, i32
  }
  func.func @transform_12(%arg0: i32, %arg1: i32) -> (i32, i32, i32) {
    %c0_i32 = arith.constant 0 : i32
    %c0_i32_0 = arith.constant 0 : i32
    %c0_i32_1 = arith.constant 0 : i32
    return %arg1, %c0_i32, %c0_i32_0 : i32, i32, i32
  }
  func.func @transform_13(%arg0: i32, %arg1: i32) -> (i32, i32) {
    %c0_i32 = arith.constant 0 : i32
    %c0_i32_0 = arith.constant 0 : i32
    %c0_i32_1 = arith.constant 0 : i32
    return %c0_i32, %c0_i32_0 : i32, i32
  }
  func.func @transform_14(%arg0: i32, %arg1: i32) -> (i32, i32) {
    %c0_i32 = arith.constant 0 : i32
    %c0_i32_0 = arith.constant 0 : i32
    %c0_i32_1 = arith.constant 0 : i32
    return %c0_i32, %c0_i32_0 : i32, i32
  }
  func.func @transform_15(%arg0: i32, %arg1: i32) -> (i32, i32) {
    %c0_i32 = arith.constant 0 : i32
    %c0_i32_0 = arith.constant 0 : i32
    return %arg0, %c0_i32 : i32, i32
  }
}

</mosaic_0001>

<bundles_post_ra>
// kernel: tpu_custom_call.1
= control target key start
LH: loop header
LB: loop body
LE: loop exit
PB: predicated region body
PF: predicated region fallthrough
CT: control target
= control target key end

     0   :  { %s2791_s0 = inlined_call_operand.vmem [shape: f32[16,32], index: 0, kind: input, shape index: {}]   ;;  %s2792_s1 = inlined_call_operand.vmem [shape: bf16[2,32,96], index: 1, kind: input, shape index: {}]   ;;  %s2793_s2 = inlined_call_operand.vmem [shape: f32[2,1,96], index: 2, kind: input, shape index: {}]   ;;  %s2794_s3 = inlined_call_operand.vmem [shape: bf16[2,32,32], index: 3, kind: input, shape index: {}]   ;;  %s2795_s4 = inlined_call_operand.vmem [shape: f32[2,1,32], index: 4, kind: input, shape index: {}]   ;;  %s2796_s5 = inlined_call_operand.vmem [shape: f32[2,1,32], index: 5, kind: input, shape index: {}]   ;;  %s2797_s6 = inlined_call_operand.vmem [shape: f32[2,1,32], index: 6, kind: input, shape index: {}]   ;;  %s2798_s7 = inlined_call_operand.vmem [shape: bf16[2,32,128], index: 7, kind: input, shape index: {}]   ;;  %s2799_s8 = inlined_call_operand.vmem [shape: f32[2,1,128], index: 8, kind: input, shape index: {}]   ;;  %s2800_s9 = inlined_call_operand.vmem [shape: bf16[2,128,32], index: 9, kind: input, shape index: {}]   ;;  %s2801_s10 = inlined_call_operand.vmem [shape: f32[2,1,32], index: 10, kind: input, shape index: {}]   ;;  %s2802_s11 = inlined_call_operand.vmem [shape: f32[2,1,32], index: 11, kind: input, shape index: {}]   ;;  %s2803_s12 = inlined_call_operand.vmem [shape: f32[2,1,32], index: 12, kind: input, shape index: {}]   ;;  %s2804_s13 = inlined_call_operand.vmem [shape: f32[1,32], index: 13, kind: input, shape index: {}]   ;;  %s2805_s14 = inlined_call_operand.vmem [shape: f32[1,32], index: 14, kind: input, shape index: {}]   ;;  %s2806_s15 = inlined_call_operand.hbm [shape: bf16[16,32], index: 15, kind: output, shape index: {}]  }
   0x1   :  { %2821 = sst [smem:[#allocation22_spill]] %s2791_s0 }
   0x2   :  { %2822 = sst [smem:[#allocation23_spill]] %s2792_s1 }
   0x3   :  { %2823 = sst [smem:[#allocation24_spill]] %s2794_s3 }
   0x4   :  { %2824 = sst [smem:[#allocation25_spill]] %s2798_s7 }
   0x5   :  { %2825 = sst [smem:[#allocation26_spill]] %s2800_s9 }
   0x6   :  { %2826 = sst [smem:[#allocation27_spill]] %s2804_s13 }
   0x7   :  { %2827 = sst [smem:[#allocation28_spill]] %s2805_s14 }
   0x8   :  { %2828 = sst [smem:[#allocation29_spill]] %s2806_s15 }
   0x9   :  { %20 = vsyncpa [#allocation5], 0 }
   0xa   :  { %22 = vsyncpa [#allocation5 + $0x1], 0  ;;  %s2423_s18 = smov 0   ;;  %s2425_s19 = smov 0  }
   0xb   :  { %s2427_s20 = smov 0   ;;  %s2429_s21 = smov 0  }
   0xc   :  { %s2431_s22 = smov 0   ;;  %s2433_s23 = smov 0  }
   0xd   :  { %s2435_s24 = smov 0   ;;  %s2437_s25 = smov 0  }
   0xe LB: > { %2829 = sst [smem:[#allocation9_spill]] %s2299_s18  ;;  %s1904_s26 = sadd.s32 4294967295, %s2327_s25   ;;  %s2327_s25 = sphi %s2437_s25, %s28_s25   ;;  %s2323_s24 = sphi %s2435_s24, %s2873_s24   ;;  %s2319_s23 = sphi %s2433_s23, %s2872_s23   ;;  %s2315_s22 = sphi %s2431_s22, %s2871_s22   ;;  %s2311_s21 = sphi %s2429_s21, %s2870_s21   ;;  %s2307_s20 = sphi %s2427_s20, %s2869_s20   ;;  %s2303_s19 = sphi %s2425_s19, %s2868_s19   ;;  %s2299_s18 = sphi %s2423_s18, %s2867_s18  }
   0xf   : > { %2830 = sst [smem:[#allocation10_spill]] %s2303_s19  ;;  %s1905_s27 = sadd.s32 4294967294, %s2327_s25  }
  0x10   : > { %2831 = sst [smem:[#allocation11_spill]] %s2307_s20  ;;  %s37_s28 = sadd.s32 1, %s2319_s23 }
  0x11   : > { %2832 = sst [smem:[#allocation12_spill]] %s2311_s21  ;;  %p38_p0 = scmp.ge.s32.totalorder %s37_s28, 2 }
  0x12   : > { %2833 = sst [smem:[#allocation13_spill]] %s2315_s22  ;;  %s40_s29 = sadd.s32 1, %s2323_s24 }
  0x13   : > { %2834 = sst [smem:[#allocation14_spill]] %s2319_s23  ;;  %p411_p1 = scmp.ne.s32.totalorder %s2307_s20, %s2303_s19 }
  0x14   : > { %2835 = sst [smem:[#allocation15_spill]] %s2323_s24  ;;  %p412_p2 = scmp.eq.s32.totalorder %s1904_s26, 3 }
  0x15   : > { %2836 = sst [smem:[#allocation16_spill]] %s2327_s25  ;;  %s2875_s28 = smov (%p38_p0, %s37_s28), 0 }
  0x16   : > { %2837 = sst [smem:[#allocation17_spill]] %s2875_s28  ;;  %s2877_s29 = smov (!%p38_p0, %s40_s29), %s2323_s24 }
  0x17   : > { %p2472_p3 = por %p412_p2, %p411_p1  ;;  %p417_p4 = scmp.ne.s32.totalorder %s2303_s19, %s2299_s18 }
  0x18   : > { %p42_p5 = scmp.ge.s32.totalorder %s2877_s29, 2  ;;  %p418_p6 = scmp.eq.s32.totalorder %s1905_s27, 3 }
  0x19   : > { %s2838_s30 = scalar_select %p2472_p3, 1, 0 }
  0x1a   : > { %p1908_p7 = scmp.ge.s32.totalorder %s2327_s25, 1  ;;  %p522_p8 = scmp.lt.s32.totalorder %s2327_s25, 5 }
  0x1b   : > { %2839 = sst [smem:[#allocation18_spill]] %s2838_s30  ;;  %s2879_s29 = smov (%p42_p5, %s2877_s29), 0 }
  0x1c   : > { %2840 = sst [smem:[#allocation19_spill]] %s2879_s29  ;;  %p2482_p9 = por %p418_p6, %p417_p4 }
  0x1d   : > { %p523_p10 = pnand %p1908_p7, %p522_p8  ;;  %s398_s17 = ssub.s32 %s2323_s24, %s2879_s29 }
  0x1e   : > { %s2841_s16 = scalar_select %p2482_p9, 1, 0 }
  0x1f   : > { %s401_s26 = sadd.s32 1, %s2307_s20  ;;  %p399_p11 = scmp.eq.s32.totalorder %s398_s17, 0 }
  0x20   : > { %2842 = sst [smem:[#allocation20_spill]] %s2841_s16  ;;  %526 = sbr.rel (%p523_p10) target bundleno = 4063 (0xfdf), region = 76 }
  0x21   : > { %s2490_s28 = scalar_select %p399_p11, %s2307_s20, %s401_s26  }
  0x22   : > { %s2811_s27 = sand.u32 (!%p523_p10), 1, %s2303_s19   ;;  %p607_p12 = scmp.lt.s32.totalorder (!%p523_p10), %s2311_s21, 1 }
  0x23   : > { %2843 = sst [smem:[#allocation21_spill]] %s2490_s28  ;;  %s2496_s23 = sshll.u32 (!%p523_p10), %s2811_s27, 2 }
  0x24   : > { %s2844_s1 = sld [smem:[#allocation23_spill]] (!%p523_p10)  ;;  %s2845_s3 = sld [smem:[#allocation24_spill]] (!%p523_p10) }
  0x25   : > { %s2846_s7 = sld [smem:[#allocation25_spill]] (!%p523_p10)  ;;  %s2847_s9 = sld [smem:[#allocation26_spill]] (!%p523_p10) }
  0x26   : > { %s606_s25 = scalar_lea.vmem (!%p523_p10), [#allocation4], %s2496_s23  ;;  %s2848_s16 = sld [smem:[#allocation12_spill]] (!%p523_p10) }
  0x27   : > { %s2499_s18 = scalar_select %p607_p12, %s2311_s21, 1 }
  0x29   : > { %s1962_s17 = sshll.u32 %s2499_s18, 4  ;;  %s644_s21 = scalar_lea.vmem %s2801_s10, %s2499_s18 }
  0x2a   : > { %s611_s20 = scalar_lea.vmem %s2844_s1, %s1962_s17  ;;  %s2512_s15 = scalar_lea.vmem %s2845_s3, %s1962_s17 }
  0x2b   : > { %s2529_s27 = scalar_lea.vmem %s2846_s7, %s1962_s17  ;;  %s1965_s3 = sshll.u32 %s2499_s18, 6 }
  0x2c   : > { %s2539_s14 = scalar_lea.vmem %s2847_s9, %s1965_s3  ;;  %s647_s24 = scalar_lea.vmem %s2802_s11, %s2499_s18 }
  0x2d   : > { %s650_s22 = scalar_lea.vmem %s2803_s12, %s2499_s18  ;;  %p1918_p13 = scmp.ne.s32.totalorder %s2848_s16, 0 }
  0x2e   : > { %s2849_s1 = sld [smem:[#allocation13_spill]] (!%p1918_p13)  ;;  %s2850_s7 = sld [smem:[#allocation22_spill]] (!%p1918_p13) }
  0x2f   : > { %655 = sbr.rel (%p1918_p13) target bundleno = 59 (0x3b), region = 80 }
  0x34   : > { %s1919_s19 = sshll.u32 (!%p1918_p13), %s2849_s1, 3 }
  0x35   : > { %s657_s9 = scalar_lea.vmem (!%p1918_p13), %s2850_s7, %s1919_s19 }
  0x36   : > { %v690_v0 = vld [vmem:[%s657_s9] sm:$0xff] }
  0x37   : > { %691 = vst [vmem:[#allocation2] sm:$0xff] %v690_v0 }
  0x38   : > { %699 = vsyncadd [#allocation3], 128 }
  0x39   : > { %2291 = dma.done.wait [#allocation3], 128 }
  0x3a   : > { %2292 = vsyncadd [#allocation3], 4294967168 }
  0x3b PF: > { %v2197_v1 = vld [vmem:[%s611_s20] sm:$0xff]   ;;  %v2329_v2 = vmov 0.0   ;;  %v2198_v3 = vld [vmem:[%s611_s20 + $0x8] sm:$0xff]   ;;  %vm2330_vm0 = vmmov 0   ;;  %vm728_vm1 = vcmask 261120   ;;  %s2851_s9 = scalar_lea.vmem %s2793_s2, %s2499_s18  ;;  %s2331_s20 = smov 120  }
  0x3c   : > { %2005 = vmatprep.subr.bf16.mxu1 %v2329_v2  ;;  %2031 = vmatprep.subr.bf16.mxu0 %v2329_v2  ;;  %v1920_v6 = vld [vmem:[%s2851_s9] ss:$0 sm:$0xff]  ;;  %s2332_s26 = smov 96   ;;  %s2333_s0 = smov 88   ;;  %vm777_vm2 = vcmask 64512   ;;  %vm841_vm3 = vcmask 1043456  }
  0x3d   : > { %2006 = vmatpush3.bf16.msra.mxu1 %v2197_v1  ;;  %2009 = vmatprep.mubr.msk.bf16.mxu1 %vm2330_vm0, %v2329_v2  ;;  %s2334_s13 = smov 56   ;;  %s2335_s29 = smov 64   ;;  %v886_v42 = vld [vmem:[%s2512_s15] sm:$0xf]  ;;  %v1051_v60 = vld [vmem:[%s2512_s15 + $0x4] sm:$0xf] }
  0x3e   : > { %v2563_v4 = vld [vmem:[#allocation2] sm:$0xff]  ;;  %2007 = vmatprep.subr.bf16.mxu1 %v2329_v2  ;;  %2033 = vmatprep.mubr.msk.bf16.mxu0 %vm2330_vm0, %v2329_v2  ;;  %s2336_s17 = smov 80   ;;  %s2337_s28 = smov 112   ;;  %v891_v45 = vsel %vm841_vm3, %v886_v42, 0  ;;  %v1056_v61 = vsel %vm841_vm3, %v1051_v60, 0 }
  0x3f   : > { %v704_v5 = vpack.c.bf16 %v2563_v4, %v2563_v4  ;;  %s2338_s16 = smov 72   ;;  %s2339_s19 = smov 104  }
  0x40   : > { %s2340_s3 = smov 48   ;;  %s2852_s7 = scalar_lea.vmem %s2795_s4, %s2499_s18 }
  0x41   : > { %2008 = vmatpush3.bf16.msra.mxu1 %v2198_v3  ;;  %s2341_s9 = smov 40   ;;  %s2856_s1 = sld [smem:[#allocation12_spill]] }
  0x42   : > { %2013 = vmatprep.subr.bf16.mxu1 %v2329_v2 }
  0x44   : > { %2010 = vmatmul.mubr.msk.bf16.vlgmr.msra.gmra.mrb[0].mxu1 %vm728_vm1, %v704_v5 }
  0x45   : > { %2015 = vmatprep.mubr.msk.bf16.mxu1 %vm2330_vm0, %v2329_v2 }
  0x47   : > { %p1954_p0 = scmp.ne.s32.totalorder %s2856_s1, 1 }
  0x48   : > { %vm1694_vm4 = vcmask (!%p1954_p0), 257024  }
 0x117   : > { %v766_v7 = vpop.f32.mrb[0].mxu1 }
 0x118   : > { %v767_v8 = vadd.f32 %v1920_v6, %v766_v7  ;;  %v2011_v9 = vpop.f32.mrb[1].mxu1 }
 0x119   : > { %v769_v10 = vpop.f32.mrb[2].mxu1 }
 0x11a   : > { %v2579_v11 = vpack.c.bf16 %v767_v8, %v767_v8  ;;  %v2012_v12 = vpop.f32.mrb[3].mxu1 }
 0x11c   : > { %940 = vrot.lane.b32.xlu1 %v2579_v11, %s2331_s20  ;;  %775 = vrot.lane.b32.xlu0 %v2579_v11, %s2332_s26  ;;  %s2853_s20 = scalar_lea.vmem %s2796_s5, %s2499_s18 }
 0x120   : > { %942 = vrot.lane.b32.xlu0 %v2579_v11, %s2333_s0 }
 0x18e   : > { %v776_v13 = vpop.permute.xlu0 %775  ;;  %v941_v17 = vpop.permute.xlu1 %940 }
 0x18f   : > { %v782_v14 = vsel %vm777_vm2, %v776_v13, 0 }
 0x190   : > { %2014 = vmatpush3.bf16.xpose.msra.mxu1 %v782_v14 }
 0x191   : > { %2019 = vmatprep.subr.bf16.mxu1 %v2329_v2 }
 0x192   : > { %v943_v15 = vpop.permute.xlu0 %942 }
 0x193   : > { %v948_v16 = vsel %vm777_vm2, %v943_v15, 0 }
 0x194   : > { %2032 = vmatpush3.bf16.xpose.msra.mxu0 %v948_v16 }
 0x195   : > { %2043 = vmatprep.subr.bf16.mxu0 %v2329_v2 }
 0x197   : > { %2016 = vmatmul.mubr.msk.bf16.vlgmr.msra.gmra.mrb[4].mxu1 %vm777_vm2, %v2579_v11 }
 0x198   : > { %2021 = vmatprep.mubr.msk.bf16.mxu1 %vm2330_vm0, %v2329_v2 }
 0x19b   : > { %2034 = vmatmul.mubr.msk.bf16.vlgmr.msra.gmra.mrb[0].mxu0 %vm777_vm2, %v941_v17 }
 0x19c   : > { %2045 = vmatprep.mubr.msk.bf16.mxu0 %vm2330_vm0, %v2329_v2  ;;  %2044 = vmatpush3.bf16.msra.mxu0 %v1056_v61 }
 0x19d   : > { %2055 = vmatprep.subr.bf16.mxu0 %v2329_v2 }
 0x26a   : > { %v818_v18 = vpop.f32.mrb[4].mxu1 }
 0x26b   : > { %v2017_v19 = vpop.f32.mrb[5].mxu1  ;;  %v824_v20 = vsel %vm777_vm2, %v818_v18, -inf }
 0x26c   : > { %825 = vmax.xlane.f32.xlu1 %v824_v20  ;;  %v821_v21 = vpop.f32.mrb[6].mxu1  ;;  %v1927_v20 = vld [vmem:[%s2852_s7] ss:$0 sm:$0xff] }
 0x26d   : > { %v2018_v22 = vpop.f32.mrb[7].mxu1 }
 0x26e   : > { %v984_v23 = vpop.f32.mrb[0].mxu0 }
 0x26f   : > { %v2035_v24 = vpop.f32.mrb[1].mxu0  ;;  %v990_v25 = vsel %vm777_vm2, %v984_v23, -inf }
 0x270   : > { %v987_v26 = vpop.f32.mrb[2].mxu0  ;;  %991 = vmax.xlane.f32.xlu1 %v990_v25 }
 0x271   : > { %v2036_v27 = vpop.f32.mrb[3].mxu0 }
 0x2f9   : > { %v826_v28 = vpop.xlane.xlu1 %825 }
 0x2fa   : > { %v827_v29 = vsub.f32 %v818_v18, %v826_v28 }
 0x2fc   : > { %v828_v30 = vmul.f32 1.442695, %v827_v29 }
 0x2fd   : > { %v992_v31 = vpop.xlane.xlu1 %991 }
 0x2fe   : > { %2209 = vpow2.f32 %v828_v30  ;;  %v993_v32 = vsub.f32 %v984_v23, %v992_v31 }
 0x300   : > { %v994_v33 = vmul.f32 1.442695, %v993_v32 }
 0x302   : > { %2211 = vpow2.f32 %v994_v33 }
 0x308   : > { %v2210_v34 = vpop.eup %2209 }
 0x309   : > { %v830_v35 = vsel %vm777_vm2, %v2210_v34, 0.0 }
 0x30a   : > { %831 = vadd.xlane.f32.xlu0 %v830_v35 }
 0x30c   : > { %v2212_v36 = vpop.eup %2211 }
 0x30d   : > { %v996_v37 = vsel %vm777_vm2, %v2212_v36, 0.0 }
 0x30e   : > { %997 = vadd.xlane.f32.xlu1 %v996_v37 }
 0x31f   : > { %1002 = vrot.lane.b32.xlu1 %v2579_v11, %s2334_s13  ;;  %s2854_s13 = scalar_lea.vmem %s2797_s6, %s2499_s18 }
 0x320   : > { %836 = vrot.lane.b32.xlu0 %v2579_v11, %s2335_s29 }
 0x324   : > { %1101 = vrot.lane.b32.xlu0 %v2579_v11, %s2336_s17 }
 0x328   : > { %1099 = vrot.lane.b32.xlu0 %v2579_v11, %s2337_s28  ;;  %s2855_s28 = scalar_lea.vmem %s2799_s8, %s2499_s18 }
 0x397   : > { %v832_v38 = vpop.xlane.xlu0 %831 }
 0x398   : > { %2213 = vrcp.f32 %v832_v38 }
 0x39b   : > { %v837_v39 = vpop.permute.xlu0 %836  ;;  %v998_v46 = vpop.xlane.xlu1 %997 }
 0x39c   : > { %v843_v40 = vsel %vm841_vm3, %v837_v39, 0  ;;  %2215 = vrcp.f32 %v998_v46 }
 0x39d   : > { %2020 = vmatpush3.bf16.msra.mxu1 %v843_v40 }
 0x39e   : > { %2025 = vmatprep.subr.bf16.mxu1 %v2329_v2 }
 0x39f   : > { %v1003_v47 = vpop.permute.xlu1 %1002  ;;  %v1102_v56 = vpop.permute.xlu0 %1101 }
 0x3a0   : > { %v1008_v53 = vsel %vm841_vm3, %v1003_v47, 0  ;;  %v1107_v58 = vsel %vm777_vm2, %v1102_v56, 0 }
 0x3a2   : > { %v2214_v41 = vpop.eup %2213 }
 0x3a3   : > { %v834_v43 = vmul.f32 %v2214_v41, %v2210_v34  ;;  %v1100_v59 = vpop.permute.xlu0 %1099 }
 0x3a5   : > { %v835_v44 = vpack.c.bf16 %v834_v43, %v834_v43 }
 0x3a6   : > { %v2216_v51 = vpop.eup %2215 }
 0x3a7   : > { %2022 = vmatmul.mubr.msk.bf16.vlgmr.msra.gmra.mrb[8].mxu1 %vm777_vm2, %v835_v44  ;;  %v1000_v55 = vmul.f32 %v2216_v51, %v2212_v36  ;;  %v1210_v36 = vld [vmem:[%s2512_s15 + $0x8] sm:$0xf] }
 0x3a8   : > { %2026 = vmatpush3.bf16.msra.mxu1 %v891_v45  ;;  %2027 = vmatprep.mubr.msk.bf16.mxu1 %vm2330_vm0, %v2329_v2  ;;  %v1215_v37 = vsel %vm841_vm3, %v1210_v36, 0 }
 0x3a9   : > { %2037 = vmatprep.subr.bf16.mxu1 %v2329_v2  ;;  %v1001_v57 = vpack.c.bf16 %v1000_v55, %v1000_v55  ;;  %v1369_v55 = vld [vmem:[%s2512_s15 + $0xc] sm:$0xf]  ;;  %s2858_s15 = sld [smem:[#allocation28_spill]] (!%p1954_p0) }
 0x3aa   : > { %v1374_v56 = vsel %vm841_vm3, %v1369_v55, 0 }
 0x47a   : > { %v879_v48 = vpop.f32.mrb[8].mxu1 }
 0x47b   : > { %v885_v49 = vpack.c.bf16 %v879_v48, %v879_v48  ;;  %v2023_v50 = vpop.f32.mrb[9].mxu1 }
 0x47c   : > { %v882_v52 = vpop.f32.mrb[10].mxu1 }
 0x47d   : > { %v2024_v54 = vpop.f32.mrb[11].mxu1  ;;  %2028 = vmatmul.mubr.msk.bf16.vlgmr.msra.gmra.mrb[12].mxu1 %vm777_vm2, %v885_v49 }
 0x47e   : > { %2038 = vmatpush3.bf16.msra.mxu1 %v1008_v53  ;;  %2039 = vmatprep.mubr.msk.bf16.mxu1 %vm2330_vm0, %v2329_v2 }
 0x47f   : > { %2049 = vmatprep.subr.bf16.mxu1 %v2329_v2 }
 0x485   : > { %2040 = vmatmul.mubr.msk.bf16.vlgmr.msra.gmra.mrb[16].mxu1 %vm777_vm2, %v1001_v57 }
 0x486   : > { %2051 = vmatprep.mubr.msk.bf16.mxu1 %vm2330_vm0, %v2329_v2 }
 0x487   : > { %2050 = vmatpush3.bf16.xpose.msra.mxu1 %v1107_v58 }
 0x488   : > { %2061 = vmatprep.subr.bf16.mxu1 %v2329_v2 }
 0x48e   : > { %2052 = vmatmul.mubr.msk.bf16.vlgmr.msra.gmra.mrb[20].mxu1 %vm777_vm2, %v1100_v59 }
 0x48f   : > { %2063 = vmatprep.mubr.msk.bf16.mxu1 %vm2330_vm0, %v2329_v2  ;;  %2062 = vmatpush3.bf16.msra.mxu1 %v1215_v37 }
 0x490   : > { %2073 = vmatprep.subr.bf16.mxu1 %v2329_v2 }
 0x550   : > { %v927_v62 = vpop.f32.mrb[12].mxu1 }
 0x551   : > { %v2029_v63 = vpop.f32.mrb[13].mxu1  ;;  %v939_v21 = vadd.f32 %v1927_v20, %v927_v62 }
 0x552   : > { %v930_v0 = vpop.f32.mrb[14].mxu1 }
 0x553   : > { %v2030_v1 = vpop.f32.mrb[15].mxu1 }
 0x558   : > { %v1044_v3 = vpop.f32.mrb[16].mxu1 }
 0x559   : > { %v1050_v5 = vpack.c.bf16 %v1044_v3, %v1044_v3  ;;  %v2041_v6 = vpop.f32.mrb[17].mxu1 }
 0x55a   : > { %v1047_v7 = vpop.f32.mrb[18].mxu1 }
 0x55b   : > { %v2042_v8 = vpop.f32.mrb[19].mxu1  ;;  %2046 = vmatmul.mubr.msk.bf16.vlgmr.msra.gmra.mrb[4].mxu0 %vm777_vm2, %v1050_v5 }
 0x55c   : > { %2057 = vmatprep.mubr.msk.bf16.mxu0 %vm2330_vm0, %v2329_v2 }
 0x561   : > { %v1143_v9 = vpop.f32.mrb[20].mxu1 }
 0x562   : > { %v2053_v10 = vpop.f32.mrb[21].mxu1  ;;  %v1149_v12 = vsel %vm777_vm2, %v1143_v9, -inf }
 0x563   : > { %1150 = vmax.xlane.f32.xlu1 %v1149_v12  ;;  %v1146_v13 = vpop.f32.mrb[22].mxu1 }
 0x564   : > { %v2054_v14 = vpop.f32.mrb[23].mxu1 }
 0x574   : > { %1260 = vrot.lane.b32.xlu1 %v2579_v11, %s2338_s16 }
 0x578   : > { %1258 = vrot.lane.b32.xlu1 %v2579_v11, %s2339_s19 }
 0x5f0   : > { %v1151_v15 = vpop.xlane.xlu1 %1150 }
 0x5f1   : > { %v1152_v16 = vsub.f32 %v1143_v9, %v1151_v15 }
 0x5f3   : > { %v1153_v17 = vmul.f32 1.442695, %v1152_v16 }
 0x5f4   : > { %v1261_v32 = vpop.permute.xlu1 %1260 }
 0x5f5   : > { %2217 = vpow2.f32 %v1153_v17  ;;  %v1266_v34 = vsel %vm777_vm2, %v1261_v32, 0  ;;  %v1937_v32 = vld [vmem:[%s2853_s20] ss:$0 sm:$0xff] }
 0x5f8   : > { %v1259_v35 = vpop.permute.xlu1 %1258 }
 0x5ff   : > { %v2218_v18 = vpop.eup %2217 }
 0x600   : > { %v1155_v19 = vsel %vm777_vm2, %v2218_v18, 0.0 }
 0x601   : > { %1156 = vadd.xlane.f32.xlu0 %v1155_v19 }
 0x617   : > { %1161 = vrot.lane.b32.xlu0 %v2579_v11, %s2340_s3 }
 0x62e   : > { %v1092_v22 = vpop.f32.mrb[4].mxu0 }
 0x62f   : > { %v1098_v23 = vadd.f32 %v1092_v22, %v939_v21  ;;  %v2047_v24 = vpop.f32.mrb[5].mxu0  ;;  %v2199_v21 = vld [vmem:[%s2529_s27] sm:$0xff]   ;;  %v2200_v22 = vld [vmem:[%s2529_s27 + $0x8] sm:$0xff]  }
 0x630   : > { %v1095_v25 = vpop.f32.mrb[6].mxu0  ;;  %v2203_v24 = vld [vmem:[%s2539_s14 + $0x10] sm:$0xff]  }
 0x631   : > { %v2048_v26 = vpop.f32.mrb[7].mxu0  ;;  %v2204_v25 = vld [vmem:[%s2539_s14 + $0x18] sm:$0xff]  }
 0x632   : > { %v2205_v26 = vld [vmem:[%s2539_s14 + $0x20] sm:$0xff]  }
 0x68e   : > { %v1157_v27 = vpop.xlane.xlu0 %1156 }
 0x68f   : > { %2219 = vrcp.f32 %v1157_v27  ;;  %v2206_v27 = vld [vmem:[%s2539_s14 + $0x28] sm:$0xff]  }
 0x692   : > { %v1162_v28 = vpop.permute.xlu0 %1161 }
 0x693   : > { %v1167_v29 = vsel %vm841_vm3, %v1162_v28, 0 }
 0x694   : > { %2056 = vmatpush3.bf16.msra.mxu0 %v1167_v29 }
 0x695   : > { %2067 = vmatprep.subr.bf16.mxu0 %v2329_v2 }
 0x699   : > { %v2220_v30 = vpop.eup %2219 }
 0x69a   : > { %v1159_v31 = vmul.f32 %v2220_v30, %v2218_v18 }
 0x69c   : > { %v1160_v33 = vpack.c.bf16 %v1159_v31, %v1159_v31 }
 0x69e   : > { %2058 = vmatmul.mubr.msk.bf16.vlgmr.msra.gmra.mrb[8].mxu0 %vm777_vm2, %v1160_v33 }
 0x69f   : > { %2068 = vmatpush3.bf16.xpose.msra.mxu0 %v1266_v34  ;;  %2069 = vmatprep.mubr.msk.bf16.mxu0 %vm2330_vm0, %v2329_v2  ;;  %v1938_v34 = vld [vmem:[%s2854_s13] ss:$0 sm:$0xff] }
 0x6a0   : > { %2079 = vmatprep.subr.bf16.mxu0 %v2329_v2 }
 0x6a6   : > { %2070 = vmatmul.mubr.msk.bf16.vlgmr.msra.gmra.mrb[12].mxu0 %vm777_vm2, %v1259_v35 }
 0x6a7   : > { %2081 = vmatprep.mubr.msk.bf16.mxu0 %vm2330_vm0, %v2329_v2  ;;  %2080 = vmatpush3.bf16.msra.mxu0 %v1374_v56 }
 0x6a8   : > { %2093 = vmatprep.subr.bf16.mxu0 %v2329_v2 }
 0x771   : > { %v1203_v38 = vpop.f32.mrb[8].mxu0 }
 0x772   : > { %v1209_v39 = vpack.c.bf16 %v1203_v38, %v1203_v38  ;;  %v2059_v40 = vpop.f32.mrb[9].mxu0  ;;  %v2207_v38 = vld [vmem:[%s2539_s14 + $0x30] sm:$0xff]  }
 0x773   : > { %v1206_v41 = vpop.f32.mrb[10].mxu0  ;;  %v1939_v40 = vld [vmem:[%s2855_s28] ss:$0 sm:$0xff] }
 0x774   : > { %v2060_v42 = vpop.f32.mrb[11].mxu0  ;;  %2064 = vmatmul.mubr.msk.bf16.vlgmr.msra.gmra.mrb[24].mxu1 %vm777_vm2, %v1209_v39  ;;  %v2208_v39 = vld [vmem:[%s2539_s14 + $0x38] sm:$0xff]  }
 0x775   : > { %2075 = vmatprep.mubr.msk.bf16.mxu1 %vm2330_vm0, %v2329_v2 }
 0x779   : > { %v1302_v43 = vpop.f32.mrb[12].mxu0 }
 0x77a   : > { %v2071_v44 = vpop.f32.mrb[13].mxu0  ;;  %v1308_v45 = vsel %vm777_vm2, %v1302_v43, -inf }
 0x77b   : > { %1309 = vmax.xlane.f32.xlu0 %v1308_v45  ;;  %v1305_v46 = vpop.f32.mrb[14].mxu0 }
 0x77c   : > { %v2072_v47 = vpop.f32.mrb[15].mxu0 }
 0x791   : > { %1320 = vrot.lane.b32.xlu0 %v2579_v11, %s2341_s9 }
 0x808   : > { %v1310_v48 = vpop.xlane.xlu0 %1309 }
 0x809   : > { %v1311_v49 = vsub.f32 %v1302_v43, %v1310_v48 }
 0x80b   : > { %v1312_v50 = vmul.f32 1.442695, %v1311_v49 }
 0x80c   : > { %v1321_v51 = vpop.permute.xlu0 %1320 }
 0x80d   : > { %2221 = vpow2.f32 %v1312_v50  ;;  %v1326_v52 = vsel %vm841_vm3, %v1321_v51, 0 }
 0x80e   : > { %2074 = vmatpush3.bf16.msra.mxu1 %v1326_v52 }
 0x80f   : > { %2085 = vmatprep.subr.bf16.mxu1 %v2329_v2 }
 0x817   : > { %v2222_v53 = vpop.eup %2221 }
 0x818   : > { %v1314_v54 = vsel %vm777_vm2, %v2222_v53, 0.0 }
 0x819   : > { %1315 = vadd.xlane.f32.xlu1 %v1314_v54 }
 0x847   : > { %v1251_v11 = vpop.f32.mrb[24].mxu1 }
 0x848   : > { %v1257_v57 = vadd.f32 %v1251_v11, %v1098_v23  ;;  %v2065_v58 = vpop.f32.mrb[25].mxu1  ;;  %v2202_v23 = vld [vmem:[%s2539_s14 + $0x8] sm:$0xff]  }
 0x849   : > { %v1254_v59 = vpop.f32.mrb[26].mxu1 }
 0x84a   : > { %v2066_v60 = vpop.f32.mrb[27].mxu1 }
 0x8a6   : > { %v1316_v61 = vpop.xlane.xlu1 %1315 }
 0x8a7   : > { %2223 = vrcp.f32 %v1316_v61 }
 0x8b1   : > { %v2224_v62 = vpop.eup %2223 }
 0x8b2   : > { %v1318_v63 = vmul.f32 %v2224_v62, %v2222_v53 }
 0x8b4   : > { %v1319_v0 = vpack.c.bf16 %v1318_v63, %v1318_v63  ;;  %v1952_v63 = vld [vmem:[%s647_s24] ss:$0 sm:$0xff]  ;;  %s2857_s24 = sld [smem:[#allocation27_spill]] (!%p1954_p0) }
 0x8b6   : > { %2076 = vmatmul.mubr.msk.bf16.vlgmr.msra.gmra.mrb[28].mxu1 %vm777_vm2, %v1319_v0 }
 0x8b7   : > { %2089 = vmatprep.mubr.msk.bf16.mxu1 %vm2330_vm0, %v2329_v2  ;;  %2086 = vmatpush3.bf16.msra.mxu1 %v2199_v21 }
 0x8b8   : > { %2087 = vmatprep.subr.bf16.mxu1 %v2329_v2 }
 0x8bb   : > { %2088 = vmatpush3.bf16.msra.mxu1 %v2200_v22 }
 0x989   : > { %v1362_v1 = vpop.f32.mrb[28].mxu1 }
 0x98a   : > { %v1368_v3 = vpack.c.bf16 %v1362_v1, %v1362_v1  ;;  %v2077_v5 = vpop.f32.mrb[29].mxu1  ;;  %v1953_v1 = vld [vmem:[%s650_s22] ss:$0 sm:$0xff] }
 0x98b   : > { %v1365_v6 = vpop.f32.mrb[30].mxu1 }
 0x98c   : > { %v2078_v7 = vpop.f32.mrb[31].mxu1  ;;  %2082 = vmatmul.mubr.msk.bf16.vlgmr.msra.gmra.mrb[16].mxu0 %vm777_vm2, %v1368_v3 }
 0x98d   : > { %2109 = vmatprep.mubr.msk.bf16.mxu0 %vm2330_vm0, %v2329_v2 }
 0xa5f   : > { %v1410_v8 = vpop.f32.mrb[16].mxu0 }
 0xa60   : > { %v1416_v9 = vadd.f32 %v1410_v8, %v1257_v57  ;;  %v2083_v10 = vpop.f32.mrb[17].mxu0 }
 0xa61   : > { %v1413_v12 = vpop.f32.mrb[18].mxu0 }
 0xa62   : > { %v2084_v13 = vpop.f32.mrb[19].mxu0  ;;  %v1417_v14 = vadd.f32 %v1416_v9, %v2563_v4  ;;  %v2201_v4 = vld [vmem:[%s2539_s14] sm:$0xff]  }
 0xa63   : > { %2094 = vmatpush3.bf16.msra.mxu0 %v2201_v4 }
 0xa64   : > { %v1420_v15 = vsel %vm728_vm1, %v1417_v14, 0.0  ;;  %2095 = vmatprep.subr.bf16.mxu0 %v2329_v2 }
 0xa65   : > { %1421 = vadd.xlane.f32.xlu1 %v1420_v15 }
 0xa67   : > { %2096 = vmatpush3.bf16.msra.mxu0 %v2202_v23 }
 0xa68   : > { %2097 = vmatprep.subr.bf16.mxu0 %v2329_v2 }
 0xa6b   : > { %2098 = vmatpush3.bf16.msra.mxu0 %v2203_v24 }
 0xa6c   : > { %2099 = vmatprep.subr.bf16.mxu0 %v2329_v2 }
 0xa6f   : > { %2100 = vmatpush3.bf16.msra.mxu0 %v2204_v25 }
 0xa70   : > { %2101 = vmatprep.subr.bf16.mxu0 %v2329_v2 }
 0xa73   : > { %2102 = vmatpush3.bf16.msra.mxu0 %v2205_v26 }
 0xa74   : > { %2103 = vmatprep.subr.bf16.mxu0 %v2329_v2 }
 0xa77   : > { %2104 = vmatpush3.bf16.msra.mxu0 %v2206_v27 }
 0xa78   : > { %2105 = vmatprep.subr.bf16.mxu0 %v2329_v2 }
 0xa7b   : > { %2106 = vmatpush3.bf16.msra.mxu0 %v2207_v38 }
 0xa7c   : > { %2107 = vmatprep.subr.bf16.mxu0 %v2329_v2  ;;  %v1951_v2 = vld [vmem:[%s644_s21] ss:$0 sm:$0xff] }
 0xa7f   : > { %2108 = vmatpush3.bf16.msra.mxu0 %v2208_v39 }
 0xaf2   : > { %v1422_v16 = vpop.xlane.xlu1 %1421 }
 0xaf3   : > { %v1424_v17 = vmul.f32 0.03125, %v1422_v16 }
 0xaf5   : > { %v1425_v18 = vsub.f32 %v1417_v14, %v1424_v17  ;;  %v1955_v17 = vld [vmem:[%s2857_s24] ss:$0 sm:$0xff] (!%p1954_p0) }
 0xaf7   : > { %v1426_v19 = vmul.f32 %v1425_v18, %v1425_v18 }
 0xaf9   : > { %v1427_v20 = vsel %vm728_vm1, %v1426_v19, 0.0  ;;  %v1956_v19 = vld [vmem:[%s2858_s15] ss:$0 sm:$0xff] (!%p1954_p0) }
 0xafa   : > { %1428 = vadd.xlane.f32.xlu1 %v1427_v20 }
 0xb87   : > { %v1429_v28 = vpop.xlane.xlu1 %1428 }
 0xb88   : > { %v1430_v29 = vmul.f32 0.03125, %v1429_v28 }
 0xb8a   : > { %v1431_v30 = vadd.f32 1e-05, %v1430_v29 }
 0xb8c   : > { %2225 = vrsqrt.f32 %v1431_v30 }
 0xb96   : > { %v2226_v31 = vpop.eup %2225 }
 0xb97   : > { %v1433_v33 = vmul.f32 %v2226_v31, %v1425_v18 }
 0xb99   : > { %v1440_v35 = vmul.f32 %v1937_v32, %v1433_v33 }
 0xb9b   : > { %v1447_v36 = vadd.f32 %v1938_v34, %v1440_v35 }
 0xb9d   : > { %v1448_v37 = vpack.c.bf16 %v1447_v36, %v1447_v36 }
 0xb9f   : > { %2090 = vmatmul.mubr.msk.bf16.vlgmr.msra.gmra.mrb[32].mxu1 %vm728_vm1, %v1448_v37 }
 0xc72   : > { %v1510_v41 = vpop.f32.mrb[32].mxu1 }
 0xc73   : > { %v1511_v42 = vadd.f32 %v1939_v40, %v1510_v41  ;;  %v2091_v43 = vpop.f32.mrb[33].mxu1 }
 0xc74   : > { %v1513_v44 = vpop.f32.mrb[34].mxu1 }
 0xc75   : > { %v1516_v45 = vmax.f32 %v1511_v42, 0.0  ;;  %v2092_v46 = vpop.f32.mrb[35].mxu1 }
 0xc77   : > { %v1517_v47 = vpack.c.bf16 %v1516_v45, %v1516_v45 }
 0xc79   : > { %2110 = vmatmul.mubr.bf16.vlgmr.msra.gmra.mrb[20].mxu0 %v1517_v47 }
 0xd4c   : > { %v1616_v48 = vpop.f32.mrb[20].mxu0 }
 0xd4d   : > { %v1628_v49 = vadd.f32 %v1951_v2, %v1616_v48  ;;  %v2111_v50 = vpop.f32.mrb[21].mxu0 }
 0xd4e   : > { %v1619_v51 = vpop.f32.mrb[22].mxu0 }
 0xd4f   : > { %v2112_v52 = vpop.f32.mrb[23].mxu0  ;;  %v1629_v53 = vadd.f32 %v1628_v49, %v1447_v36 }
 0xd51   : > { %v1632_v54 = vsel %vm728_vm1, %v1629_v53, 0.0 }
 0xd52   : > { %1633 = vadd.xlane.f32.xlu1 %v1632_v54 }
 0xddf   : > { %v1634_v55 = vpop.xlane.xlu1 %1633 }
 0xde0   : > { %v1635_v56 = vmul.f32 0.03125, %v1634_v55 }
 0xde2   : > { %v1636_v11 = vsub.f32 %v1629_v53, %v1635_v56 }
 0xde4   : > { %v1637_v57 = vmul.f32 %v1636_v11, %v1636_v11 }
 0xde6   : > { %v1638_v58 = vsel %vm728_vm1, %v1637_v57, 0.0 }
 0xde7   : > { %1639 = vadd.xlane.f32.xlu1 %v1638_v58 }
 0xe74   : > { %v1640_v59 = vpop.xlane.xlu1 %1639 }
 0xe75   : > { %v1641_v60 = vmul.f32 0.03125, %v1640_v59 }
 0xe77   : > { %v1642_v61 = vadd.f32 1e-05, %v1641_v60 }
 0xe79   : > { %2227 = vrsqrt.f32 %v1642_v61 }
 0xe83   : > { %v2228_v62 = vpop.eup %2227 }
 0xe84   : > { %v1644_v0 = vmul.f32 %v2228_v62, %v1636_v11  ;;  %1663 = sbr.rel (%p1954_p0) target bundleno = 4038 (0xfc6), region = 118 }
 0xe86   : > { %v1651_v3 = vmul.f32 %v1952_v63, %v1644_v0 }
 0xe88   : > { %v1658_v5 = vadd.f32 %v1953_v1, %v1651_v3 }
 0xe8a   : > { %1659 = vst.msk [vmem:[#allocation2] sm:$0xff] %vm728_vm1, %v1658_v5  ;;  %v1666_v6 = vsel (!%p1954_p0), %vm728_vm1, %v1658_v5, 0.0 }
 0xe8b   : > { %1667 = vadd.xlane.f32.xlu0 %v1666_v6 }
 0xf18   : > { %v1668_v7 = vpop.xlane.xlu0 %1667 }
 0xf19   : > { %v1669_v8 = vmul.f32 0.03125, %v1668_v7 }
 0xf1b   : > { %v1670_v9 = vsub.f32 %v1658_v5, %v1669_v8 }
 0xf1d   : > { %v1671_v10 = vmul.f32 %v1670_v9, %v1670_v9 }
 0xf1f   : > { %v1672_v12 = vsel %vm728_vm1, %v1671_v10, 0.0 }
 0xf20   : > { %1673 = vadd.xlane.f32.xlu0 %v1672_v12 }
 0xfad   : > { %v1674_v13 = vpop.xlane.xlu0 %1673 }
 0xfae   : > { %v1675_v14 = vmul.f32 0.03125, %v1674_v13 }
 0xfb0   : > { %v1676_v15 = vadd.f32 1e-05, %v1675_v14 }
 0xfb2   : > { %2229 = vrsqrt.f32 %v1676_v15 }
 0xfbc   : > { %v2230_v16 = vpop.eup %2229 }
 0xfbd   : > { %v1678_v18 = vmul.f32 %v2230_v16, %v1670_v9 }
 0xfbf   : > { %v1685_v20 = vmul.f32 %v1955_v17, %v1678_v18 }
 0xfc1   : > { %v1692_v21 = vadd.f32 %v1956_v19, %v1685_v20 }
 0xfc3   : > { %v1693_v22 = vpack.c.bf16 %v1692_v21, %v1692_v21 }
 0xfc5   : > { %1695 = vst.msk [vmem:[%s606_s25] sm:$0xf] %vm1694_vm4, %v1693_v22 }
 0xfc6 PF: > { %s2859_s27 = sld [smem:[#allocation13_spill]]  ;;  %s2860_s20 = sld [smem:[#allocation10_spill]] }
 0xfc7   : > { %s2862_s17 = sld [smem:[#allocation29_spill]]  ;;  %s1710_s16 = sshll.u32 %s606_s25, 4  ;;  %s1711_s16 = int_to_ptr.vmem [resolvable:$true] %s1710_s16 }
 0xfc8   : > { %s2231_s21 = scalar_lea.vmem %s1711_s16, 64  ;;  %s2342_s3 = smov [#allocation4]  }
 0xfc9   : > { %p2232_p1 = scmp.ne.s32.totalorder %s1711_s16, %s2231_s21  ;;  %s2235_s30 = sshll.u32 %s2342_s3, 4  ;;  %s2236_s30 = int_to_ptr.vmem [resolvable:$false] %s2235_s30 }
 0xfca   : > { %s2237_s1 = scalar_lea.vmem %s2236_s30, 128  ;;  %p2238_p5 = scmp.lt.s32.totalorder %s1711_s16, %s2236_s30 }
 0xfcb   : > { %p2233_p2 = pnand %p2232_p1, %p2472_p3  ;;  %p2239_p6 = scmp.lt.s32.totalorder %s2237_s1, %s2231_s21 }
 0xfcc   : > { %s1958_s0 = sshll.u32 %s2859_s27, 6  ;;  %s2863_s19 = sand.u32 1, %s2860_s20  }
 0xfcd   : > { %s2740_s28 = scalar_lea.hbm %s2862_s17, %s1958_s0  ;;  %s1697_s14 = scalar_lea.sflag [#allocation5], %s2863_s19 }
 0xfce   : > { %p2234_p4 = pneg %p2233_p2  ;;  %p2240_p7 = por %p2239_p6, %p2238_p5 }
 0xfd0   : > { %p2241_p8 = pnand %p2240_p7, %p2234_p4 }
 0xfd2   : > { %2244 = shalt.err (!%p2241_p8)
}
 0xfd3   : > { %s2245_s23 = scalar_lea.hbm %s2740_s28, 64  ;;  %s2249_s22 = scalar_lea.hbm %s2862_s17, 128 }
 0xfd4   : > { %p2246_p10 = scmp.ne.s32.totalorder %s2740_s28, %s2245_s23  ;;  %p2250_p13 = scmp.lt.u32.totalorder %s2740_s28, %s2862_s17 }
 0xfd5   : > { %p2251_p0 = scmp.lt.u32.totalorder %s2249_s22, %s2245_s23  ;;  %p2253_p2 = scmp.lt.u32.totalorder %s2245_s23, %s2740_s28 }
 0xfd6   : > { %p2247_p11 = pnand %p2246_p10, %p2472_p3 }
 0xfd7   : > { %p2252_p1 = por %p2251_p0, %p2250_p13 }
 0xfd8   : > { %p2248_p12 = pneg %p2247_p11 }
 0xfd9   : > { %p2254_p4 = por %p2253_p2, %p2252_p1 }
 0xfdb   : > { %p2255_p5 = pnand %p2254_p4, %p2248_p12 }
 0xfdd   : > { %2258 = shalt.err (!%p2255_p5)
}
 0xfde   : > { %2113 = dma.vmem_to_hbm [thread:$0]  (%p2472_p3), %s1711_s16, 64, %s2740_s28, %s1697_s14  }
 0xfdf PF: > { %s2864_s9 = sld [smem:[#allocation16_spill]]  ;;  %s2865_s15 = sld [smem:[#allocation9_spill]] }
 0xfe5   : > { %p2119_p6 = scmp.ge.s32.totalorder %s2864_s9, 2  ;;  %s1722_s20 = sand.u32 1, %s2865_s15  }
 0xfe6   : > { %s1723_s0 = scalar_lea.sflag [#allocation5], %s1722_s20 }
 0xfe7   : > { %p2116_p7 = pnand %p2119_p6, %p2482_p9 }
 0xfe9   : > { %2294 = dma.done.wait (!%p2116_p7), %s1723_s0, 64  }
 0xfea   : > { %2296 = vsyncadd (!%p2116_p7), %s1723_s0, 4294967232  ;;  %s28_s25 = sadd.s32 1, %s2864_s9   ;;  %s2867_s18 = sld [smem:[#allocation10_spill]] }
 0xfeb   : > { %p25_p8 = scmp.ge.s32.totalorder %s28_s25, 6   ;;  %s2868_s19 = sld [smem:[#allocation11_spill]] }
 0xfec   : > { %s2869_s20 = sld [smem:[#allocation21_spill]]  ;;  %s2870_s21 = sld [smem:[#allocation14_spill]] }
 0xfed   : > { %s2871_s22 = sld [smem:[#allocation15_spill]]  ;;  %s2872_s23 = sld [smem:[#allocation17_spill]] }
 0xfee   : > { %s2873_s24 = sld [smem:[#allocation19_spill]]  ;;  %27 = sbr.rel (!%p25_p8) target bundleno = 14 (0xe), region = 195 }
 0xff5   :  { %1728 = vsyncpa [#allocation5], 1 }
 0xff6   :  { %1730 = vsyncpa [#allocation5 + $0x1], 1 }
 0xff7   :  { %1731 = vsyncmov [#allocation3] }
 0xffa   :  { %s1732_s26 = vpop.sfrf %1731 }
 0xffb   :  { %p1961_p3 = scmp.ne.s32.totalorder %s1732_s26, 0 }
 0xffd   :  { %1736 = shalt.err (%p1961_p3)  }

</bundles_post_ra>
